<compile_context>
chip_gen: v7x
topology: tpu7x:2x2x1
jax: 0.10.0
libtpu: 0.0.40
codegen_flags: <defaults>
</compile_context>

<pallas_src>
import functools

import numpy as np
import jax
import jax.numpy as jnp
from jax.experimental import pallas as pl
from jax.experimental.pallas import tpu as pltpu

GAUSS5 = np.float32(
    [[0.003765, 0.015019, 0.023792, 0.015019, 0.003765],
     [0.015019, 0.059912, 0.094907, 0.059912, 0.015019],
     [0.023792, 0.094907, 0.150342, 0.094907, 0.023792],
     [0.015019, 0.059912, 0.094907, 0.059912, 0.015019],
     [0.003765, 0.015019, 0.023792, 0.015019, 0.003765]])


# ----------------------------------------------------------------------------
# Host-side (trace-time) constant construction
# ----------------------------------------------------------------------------
def _rank1_taps(f2d):
    """Best rank-1 (separable) factorisation of the symmetric 2D filter."""
    u_, s_, vt_ = np.linalg.svd(f2d.astype(np.float64))
    u = u_[:, 0] * np.sqrt(s_[0])
    v = vt_[0, :] * np.sqrt(s_[0])
    if u[len(u) // 2] < 0:
        u, v = -u, -v
    return u.astype(np.float32), v.astype(np.float32)


def _level_sizes(H, W, scale_n):
    sizes = [(H, W)]
    for _ in range(scale_n):
        h, w = sizes[-1]
        sizes.append(((h + 1) // 2, (w + 1) // 2))
    return sizes


def _decim_mats(u, v, Hl, Wl, Hlo, Wlo):
    """lo = Vsel @ img @ Hsel  ==  (depthwise 5x5 'same' conv of img)[::2, ::2]."""
    K = u.shape[0]
    P = K // 2
    Vsel = np.zeros((Hlo, Hl), np.float32)
    for i in range(Hlo):
        for y in range(max(0, 2 * i - P), min(Hl, 2 * i + P + 1)):
            Vsel[i, y] = u[y - 2 * i + P]
    Hsel = np.zeros((Wl, Wlo), np.float32)
    for j in range(Wlo):
        for x in range(max(0, 2 * j - P), min(Wl, 2 * j + P + 1)):
            Hsel[x, j] = v[x - 2 * j + P]
    return Vsel, Hsel


def _bilinear_mat(g, size):
    """(size, Dp) one-hot bilinear weights along one axis of length `size`
    (F.grid_sample: bilinear, align_corners=False, padding_mode='zeros')."""
    t = ((g + 1.0) * size - 1.0) * 0.5
    t0 = jnp.floor(t)
    w1 = t - t0
    i0 = t0.astype(jnp.int32)
    idx = jnp.arange(size, dtype=jnp.int32)[:, None]          # (size, 1)
    return (jnp.where(idx == i0[None, :], 1.0 - w1[None, :], 0.0)
            + jnp.where(idx == i0[None, :] + 1, w1[None, :], 0.0)
            ).astype(jnp.float32)


# ----------------------------------------------------------------------------
# The fused kernel: pyramid + grid_sample + feature reduction for TB batches
# ----------------------------------------------------------------------------
def _stp2d_kernel(*refs, sizes, scale_n, TB, C, Dp):
    x_ref, featx_ref, gsel_ref = refs[0], refs[1], refs[2]
    mats = refs[3:-1]
    out_ref = refs[-1]
    Bc = TB * C
    H0, W0 = sizes[0]

    def samp(z, ay, ax):
        # sum_{y,x} z[b, y, x] * ay[y, d] * ax[x, d]   -> (Bc, Dp)
        b, hs, ws = z.shape
        axb = jnp.broadcast_to(ax, (b, ws, Dp))
        t = jnp.einsum('byx,bxd->byd', z, axb,
                       preferred_element_type=jnp.float32)     # (Bc, hs, Dp)
        return jnp.sum(t * ay[None, :, :], axis=1)             # (Bc, Dp)

    img = x_ref[...].astype(jnp.float32).reshape(Bc, H0, W0)
    acc = jnp.zeros((Bc, Dp), jnp.float32)

    k = 0
    for l in range(scale_n):
        Hl, Wl = sizes[l]
        Hlo, Wlo = sizes[l + 1]
        wy = mats[k][...]        # (Hl, Dp)
        wx = mats[k + 1][...]    # (Wl, Dp)
        vsel = mats[k + 2][...]  # (Hlo, Hl)
        hsel = mats[k + 3][...]  # (Wl, Wlo)
        my = mats[k + 4][...]    # (Hlo, Dp)
        mx = mats[k + 5][...]    # (Wlo, Dp)
        k += 6
        fe = featx_ref[l]        # (Bc, Dp) feature weights, tiled over TB

        # grid_sample of the current level image (the "+ img" half of hi).
        acc = acc + fe * samp(img, wy, wx)

        # lo = (5x5 Gaussian 'same' depthwise conv)[::2, ::2] = Vsel @ img @ Hsel
        hb = jnp.broadcast_to(hsel, (Bc, Wl, Wlo))
        r = jnp.einsum('byx,bxj->byj', img, hb,
                       preferred_element_type=jnp.float32)     # (Bc, Hl, Wlo)
        vb = jnp.broadcast_to(vsel, (Bc, Hlo, Hl))
        lo = jnp.einsum('biy,byj->bij', vb, r,
                        preferred_element_type=jnp.float32)    # (Bc, Hlo, Wlo)

        # "- 4*conv_transpose2d(lo, f, stride=2, pad=2, out_pad)" sampled at
        # the grid; the transpose conv is folded into the sampling matrices.
        acc = acc - fe * samp(lo, my, mx)

        img = lo

    # coarsest pyramid level (the final low-pass image itself)
    wy = mats[k][...]
    wx = mats[k + 1][...]
    acc = acc + featx_ref[scale_n] * samp(img, wy, wx)

    # reduce the per-(batch, channel) rows to (TB, Dp); lane-dense store.
    out_ref[0] = jnp.dot(gsel_ref[...], acc, preferred_element_type=jnp.float32)


# ----------------------------------------------------------------------------
# Module wrapper: parameter init + forward (shift=None path)
# ----------------------------------------------------------------------------
def init_params(in_shape, outdims, scale_n=4, init_range=0.1, bias=True,
                key=jax.random.PRNGKey(0)):
    c = in_shape[0]
    m = scale_n + 1
    grid = jax.random.uniform(key, (1, outdims, 1, 2), jnp.float32,
                              minval=-init_range, maxval=init_range)
    features = jnp.full((1, c * m, 1, outdims), 1.0 / c, jnp.float32)
    return {"grid": grid, "features": features,
            "bias": jnp.zeros((outdims,), jnp.float32) if bias else None}


def spatial_transformer_pyramid2d_forward(x, params, scale_n=4, positive=False):
    """x: (N, c, w, h) -> (N, outdims) float32 (downsample=True, gauss5x5)."""
    N, C, H, W = x.shape
    D = params["grid"].shape[1]
    m = scale_n + 1
    Dp = ((D + 127) // 128) * 128            # lane-dense neuron axis

    grid = jnp.clip(params["grid"].astype(jnp.float32), -1.0, 1.0)
    feat = params["features"].astype(jnp.float32).reshape(m, C, D)
    if positive:
        feat = jnp.maximum(feat, 0.0)

    gx = jnp.pad(grid[0, :, 0, 0], (0, Dp - D))   # grid[...,0] -> width (last)
    gy = jnp.pad(grid[0, :, 0, 1], (0, Dp - D))   # grid[...,1] -> height (-2)
    featp = jnp.pad(feat, ((0, 0), (0, 0), (0, Dp - D)))

    sizes = _level_sizes(H, W, scale_n)
    u, v = _rank1_taps(GAUSS5)

    # Batch blocking: TB elements per grid step; keep >=2 "parallel" steps
    # when possible so both v7x TensorCores get work.
    if N >= 16:
        TB = 8
    elif N >= 2:
        TB = min(8, N // 2)
    else:
        TB = 1
    nb = -(-N // TB)
    Bpad = nb * TB
    xp = x.astype(jnp.float32)
    if Bpad != N:
        xp = jnp.pad(xp, ((0, Bpad - N), (0, 0), (0, 0), (0, 0)))
    Bc = TB * C

    # Hoisted, per-call constants (never recomputed inside the batch grid).
    featx = jnp.stack([jnp.tile(featp[l], (TB, 1)) for l in range(m)])  # (m,Bc,Dp)
    gsel = np.kron(np.eye(TB, dtype=np.float32), np.ones((1, C), np.float32))

    ops = [xp, featx, jnp.asarray(gsel)]
    in_specs = [
        pl.BlockSpec((TB, C, H, W), lambda b: (b, 0, 0, 0)),
        pl.BlockSpec((m, Bc, Dp), lambda b: (0, 0, 0)),
        pl.BlockSpec((TB, Bc), lambda b: (0, 0)),
    ]

    def add_const(a):
        a = jnp.asarray(a, jnp.float32)
        ops.append(a)
        in_specs.append(pl.BlockSpec(a.shape, lambda b, _r=a.ndim: (0,) * _r))

    for l in range(scale_n):
        Hl, Wl = sizes[l]
        Hlo, Wlo = sizes[l + 1]
        WyT = _bilinear_mat(gy, Hl)                      # (Hl, Dp)
        WxT = _bilinear_mat(gx, Wl)                      # (Wl, Dp)
        Vsel, Hsel = _decim_mats(u, v, Hl, Wl, Hlo, Wlo)
        MyT = 4.0 * (jnp.asarray(Vsel) @ WyT)            # (Hlo, Dp)
        MxT = jnp.asarray(Hsel).T @ WxT                  # (Wlo, Dp)
        for a in (WyT, WxT, Vsel, Hsel, MyT, MxT):
            add_const(a)
    Hm, Wm = sizes[scale_n]
    add_const(_bilinear_mat(gy, Hm))
    add_const(_bilinear_mat(gx, Wm))

    kernel = functools.partial(_stp2d_kernel, sizes=tuple(sizes),
                               scale_n=scale_n, TB=TB, C=C, Dp=Dp)
    out = pl.pallas_call(
        kernel,
        out_shape=jax.ShapeDtypeStruct((nb, TB, Dp), jnp.float32),
        grid=(nb,),
        in_specs=in_specs,
        out_specs=pl.BlockSpec((1, TB, Dp), lambda b: (b, 0, 0)),
        compiler_params=pltpu.CompilerParams(
            dimension_semantics=("parallel",)),
    )(*ops)

    y = out.reshape(Bpad, Dp)[:N, :D]
    if params.get("bias") is not None:
        y = y + params["bias"]
    return y


if __name__ == "__main__":
    # Small shapes: N=2, c=4, w=h=16, outdims=8, scale_n=4
    N, C, H, W = 2, 4, 16, 16
    outdims, scale_n = 8, 4

    key = jax.random.PRNGKey(0)
    kx, kp = jax.random.split(key)
    x = jax.random.normal(kx, (N, C, H, W), jnp.float32)

    params = init_params((C, H, W), outdims, scale_n=scale_n, key=kp)

    y = spatial_transformer_pyramid2d_forward(x, params, scale_n=scale_n,
                                              positive=False)
    y = jax.block_until_ready(y)
    assert y.shape == (N, outdims), y.shape
    assert bool(jnp.all(jnp.isfinite(y)))
    print("KERNEL_OK")
</pallas_src>

<mosaic_0001>
module attributes {stable_mosaic.version = 11 : i64} {
  func.func @_stp2d_kernel(%arg0: i32, %arg1: memref<1x4x16x16xf32, #tpu.memory_space<vmem>>, %arg2: memref<5x4x128xf32, #tpu.memory_space<vmem>>, %arg3: memref<1x4xf32, #tpu.memory_space<vmem>>, %arg4: memref<16x128xf32, #tpu.memory_space<vmem>>, %arg5: memref<16x128xf32, #tpu.memory_space<vmem>>, %arg6: memref<8x16xf32, #tpu.memory_space<vmem>>, %arg7: memref<16x8xf32, #tpu.memory_space<vmem>>, %arg8: memref<8x128xf32, #tpu.memory_space<vmem>>, %arg9: memref<8x128xf32, #tpu.memory_space<vmem>>, %arg10: memref<8x128xf32, #tpu.memory_space<vmem>>, %arg11: memref<8x128xf32, #tpu.memory_space<vmem>>, %arg12: memref<4x8xf32, #tpu.memory_space<vmem>>, %arg13: memref<8x4xf32, #tpu.memory_space<vmem>>, %arg14: memref<4x128xf32, #tpu.memory_space<vmem>>, %arg15: memref<4x128xf32, #tpu.memory_space<vmem>>, %arg16: memref<4x128xf32, #tpu.memory_space<vmem>>, %arg17: memref<4x128xf32, #tpu.memory_space<vmem>>, %arg18: memref<2x4xf32, #tpu.memory_space<vmem>>, %arg19: memref<4x2xf32, #tpu.memory_space<vmem>>, %arg20: memref<2x128xf32, #tpu.memory_space<vmem>>, %arg21: memref<2x128xf32, #tpu.memory_space<vmem>>, %arg22: memref<2x128xf32, #tpu.memory_space<vmem>>, %arg23: memref<2x128xf32, #tpu.memory_space<vmem>>, %arg24: memref<1x2xf32, #tpu.memory_space<vmem>>, %arg25: memref<2x1xf32, #tpu.memory_space<vmem>>, %arg26: memref<1x128xf32, #tpu.memory_space<vmem>>, %arg27: memref<1x128xf32, #tpu.memory_space<vmem>>, %arg28: memref<1x128xf32, #tpu.memory_space<vmem>>, %arg29: memref<1x128xf32, #tpu.memory_space<vmem>>, %arg30: memref<1x1x128xf32, #tpu.memory_space<vmem>>) attributes {dimension_semantics = [#tpu.dimension_semantics<parallel>], iteration_bounds = array<i64: 2>, scalar_prefetch = 0 : i64, scratch_operands = 0 : i64, tpu.core_type = #tpu.core_type<tc>, window_params = [{transform_indices = @transform_0, window_bounds = array<i64: 1, 4, 16, 16>}, {pipeline_mode = #tpu.pipeline_mode<synchronous>, transform_indices = @transform_1, window_bounds = array<i64: 5, 4, 128>}, {pipeline_mode = #tpu.pipeline_mode<synchronous>, transform_indices = @transform_2, window_bounds = array<i64: 1, 4>}, {pipeline_mode = #tpu.pipeline_mode<synchronous>, transform_indices = @transform_3, window_bounds = array<i64: 16, 128>}, {pipeline_mode = #tpu.pipeline_mode<synchronous>, transform_indices = @transform_4, window_bounds = array<i64: 16, 128>}, {pipeline_mode = #tpu.pipeline_mode<synchronous>, transform_indices = @transform_5, window_bounds = array<i64: 8, 16>}, {pipeline_mode = #tpu.pipeline_mode<synchronous>, transform_indices = @transform_6, window_bounds = array<i64: 16, 8>}, {pipeline_mode = #tpu.pipeline_mode<synchronous>, transform_indices = @transform_7, window_bounds = array<i64: 8, 128>}, {pipeline_mode = #tpu.pipeline_mode<synchronous>, transform_indices = @transform_8, window_bounds = array<i64: 8, 128>}, {pipeline_mode = #tpu.pipeline_mode<synchronous>, transform_indices = @transform_9, window_bounds = array<i64: 8, 128>}, {pipeline_mode = #tpu.pipeline_mode<synchronous>, transform_indices = @transform_10, window_bounds = array<i64: 8, 128>}, {pipeline_mode = #tpu.pipeline_mode<synchronous>, transform_indices = @transform_11, window_bounds = array<i64: 4, 8>}, {pipeline_mode = #tpu.pipeline_mode<synchronous>, transform_indices = @transform_12, window_bounds = array<i64: 8, 4>}, {pipeline_mode = #tpu.pipeline_mode<synchronous>, transform_indices = @transform_13, window_bounds = array<i64: 4, 128>}, {pipeline_mode = #tpu.pipeline_mode<synchronous>, transform_indices = @transform_14, window_bounds = array<i64: 4, 128>}, {pipeline_mode = #tpu.pipeline_mode<synchronous>, transform_indices = @transform_15, window_bounds = array<i64: 4, 128>}, {pipeline_mode = #tpu.pipeline_mode<synchronous>, transform_indices = @transform_16, window_bounds = array<i64: 4, 128>}, {pipeline_mode = #tpu.pipeline_mode<synchronous>, transform_indices = @transform_17, window_bounds = array<i64: 2, 4>}, {pipeline_mode = #tpu.pipeline_mode<synchronous>, transform_indices = @transform_18, window_bounds = array<i64: 4, 2>}, {pipeline_mode = #tpu.pipeline_mode<synchronous>, transform_indices = @transform_19, window_bounds = array<i64: 2, 128>}, {pipeline_mode = #tpu.pipeline_mode<synchronous>, transform_indices = @transform_20, window_bounds = array<i64: 2, 128>}, {pipeline_mode = #tpu.pipeline_mode<synchronous>, transform_indices = @transform_21, window_bounds = array<i64: 2, 128>}, {pipeline_mode = #tpu.pipeline_mode<synchronous>, transform_indices = @transform_22, window_bounds = array<i64: 2, 128>}, {pipeline_mode = #tpu.pipeline_mode<synchronous>, transform_indices = @transform_23, window_bounds = array<i64: 1, 2>}, {pipeline_mode = #tpu.pipeline_mode<synchronous>, transform_indices = @transform_24, window_bounds = array<i64: 2, 1>}, {pipeline_mode = #tpu.pipeline_mode<synchronous>, transform_indices = @transform_25, window_bounds = array<i64: 1, 128>}, {pipeline_mode = #tpu.pipeline_mode<synchronous>, transform_indices = @transform_26, window_bounds = array<i64: 1, 128>}, {pipeline_mode = #tpu.pipeline_mode<synchronous>, transform_indices = @transform_27, window_bounds = array<i64: 1, 128>}, {pipeline_mode = #tpu.pipeline_mode<synchronous>, transform_indices = @transform_28, window_bounds = array<i64: 1, 128>}, {transform_indices = @transform_29, window_bounds = array<i64: 1, 1, 128>}]} {
    %c0 = arith.constant 0 : index
    %c0_0 = arith.constant 0 : index
    %c0_1 = arith.constant 0 : index
    %c0_2 = arith.constant 0 : index
    %0 = vector.load %arg1[%c0, %c0_0, %c0_1, %c0_2] : memref<1x4x16x16xf32, #tpu.memory_space<vmem>>, vector<1x4x16x16xf32>
    %1 = vector.shape_cast %0 : vector<1x4x16x16xf32> to vector<4x16x16xf32>
    %cst = arith.constant 0.000000e+00 : f32
    %2 = vector.broadcast %cst : f32 to vector<4x128xf32>
    %c0_3 = arith.constant 0 : index
    %c0_4 = arith.constant 0 : index
    %3 = vector.load %arg4[%c0_3, %c0_4] : memref<16x128xf32, #tpu.memory_space<vmem>>, vector<16x128xf32>
    %c0_5 = arith.constant 0 : index
    %c0_6 = arith.constant 0 : index
    %4 = vector.load %arg5[%c0_5, %c0_6] : memref<16x128xf32, #tpu.memory_space<vmem>>, vector<16x128xf32>
    %c0_7 = arith.constant 0 : index
    %c0_8 = arith.constant 0 : index
    %5 = vector.load %arg6[%c0_7, %c0_8] : memref<8x16xf32, #tpu.memory_space<vmem>>, vector<8x16xf32>
    %c0_9 = arith.constant 0 : index
    %c0_10 = arith.constant 0 : index
    %6 = vector.load %arg7[%c0_9, %c0_10] : memref<16x8xf32, #tpu.memory_space<vmem>>, vector<16x8xf32>
    %c0_11 = arith.constant 0 : index
    %c0_12 = arith.constant 0 : index
    %7 = vector.load %arg8[%c0_11, %c0_12] : memref<8x128xf32, #tpu.memory_space<vmem>>, vector<8x128xf32>
    %c0_13 = arith.constant 0 : index
    %c0_14 = arith.constant 0 : index
    %8 = vector.load %arg9[%c0_13, %c0_14] : memref<8x128xf32, #tpu.memory_space<vmem>>, vector<8x128xf32>
    %c0_15 = arith.constant 0 : index
    %c0_16 = arith.constant 0 : index
    %c0_17 = arith.constant 0 : index
    %9 = vector.load %arg2[%c0_15, %c0_16, %c0_17] : memref<5x4x128xf32, #tpu.memory_space<vmem>>, vector<1x4x128xf32>
    %10 = vector.shape_cast %9 : vector<1x4x128xf32> to vector<4x128xf32>
    %11 = vector.shape_cast %4 : vector<16x128xf32> to vector<1x16x128xf32>
    %12 = vector.broadcast %11 : vector<1x16x128xf32> to vector<4x16x128xf32>
    "tpu.trace_start"() <{level = 10 : i32, message = "byx,bxd->byd"}> : () -> ()
    %cst_18 = arith.constant dense<0.000000e+00> : vector<4x16x128xf32>
    %13 = tpu.matmul %1, %12, %cst_18 {dimension_numbers = #tpu.dot_dimension_numbers<[2], [1], [1], [2], [0, 0, 0, 1, 1, 2], [0], [0]>} : vector<4x16x16xf32>, vector<4x16x128xf32>, vector<4x16x128xf32> -> vector<4x16x128xf32>
    "tpu.trace_stop"() : () -> ()
    %14 = vector.shape_cast %3 : vector<16x128xf32> to vector<1x16x128xf32>
    %15 = vector.broadcast %14 : vector<1x16x128xf32> to vector<4x16x128xf32>
    %16 = arith.mulf %13, %15 : vector<4x16x128xf32>
    %cst_19 = arith.constant dense<0.000000e+00> : vector<4x128xf32>
    %17 = vector.multi_reduction <add>, %16, %cst_19 [1] : vector<4x16x128xf32> to vector<4x128xf32>
    %18 = arith.mulf %10, %17 : vector<4x128xf32>
    %19 = arith.addf %2, %18 : vector<4x128xf32>
    %20 = vector.shape_cast %6 : vector<16x8xf32> to vector<1x16x8xf32>
    %21 = vector.broadcast %20 : vector<1x16x8xf32> to vector<4x16x8xf32>
    "tpu.trace_start"() <{level = 10 : i32, message = "byx,bxj->byj"}> : () -> ()
    %cst_20 = arith.constant dense<0.000000e+00> : vector<4x16x8xf32>
    %22 = tpu.matmul %1, %21, %cst_20 {dimension_numbers = #tpu.dot_dimension_numbers<[2], [1], [1], [2], [0, 0, 0, 1, 1, 2], [0], [0]>} : vector<4x16x16xf32>, vector<4x16x8xf32>, vector<4x16x8xf32> -> vector<4x16x8xf32>
    "tpu.trace_stop"() : () -> ()
    %23 = vector.shape_cast %5 : vector<8x16xf32> to vector<1x8x16xf32>
    %24 = vector.broadcast %23 : vector<1x8x16xf32> to vector<4x8x16xf32>
    "tpu.trace_start"() <{level = 10 : i32, message = "biy,byj->bij"}> : () -> ()
    %cst_21 = arith.constant dense<0.000000e+00> : vector<4x8x8xf32>
    %25 = tpu.matmul %24, %22, %cst_21 {dimension_numbers = #tpu.dot_dimension_numbers<[2], [1], [1], [2], [0, 0, 0, 1, 1, 2], [0], [0]>} : vector<4x8x16xf32>, vector<4x16x8xf32>, vector<4x8x8xf32> -> vector<4x8x8xf32>
    "tpu.trace_stop"() : () -> ()
    %26 = vector.shape_cast %8 : vector<8x128xf32> to vector<1x8x128xf32>
    %27 = vector.broadcast %26 : vector<1x8x128xf32> to vector<4x8x128xf32>
    "tpu.trace_start"() <{level = 10 : i32, message = "byx,bxd->byd"}> : () -> ()
    %cst_22 = arith.constant dense<0.000000e+00> : vector<4x8x128xf32>
    %28 = tpu.matmul %25, %27, %cst_22 {dimension_numbers = #tpu.dot_dimension_numbers<[2], [1], [1], [2], [0, 0, 0, 1, 1, 2], [0], [0]>} : vector<4x8x8xf32>, vector<4x8x128xf32>, vector<4x8x128xf32> -> vector<4x8x128xf32>
    "tpu.trace_stop"() : () -> ()
    %29 = vector.shape_cast %7 : vector<8x128xf32> to vector<1x8x128xf32>
    %30 = vector.broadcast %29 : vector<1x8x128xf32> to vector<4x8x128xf32>
    %31 = arith.mulf %28, %30 : vector<4x8x128xf32>
    %cst_23 = arith.constant dense<0.000000e+00> : vector<4x128xf32>
    %32 = vector.multi_reduction <add>, %31, %cst_23 [1] : vector<4x8x128xf32> to vector<4x128xf32>
    %33 = arith.mulf %10, %32 : vector<4x128xf32>
    %34 = arith.subf %19, %33 : vector<4x128xf32>
    %c0_24 = arith.constant 0 : index
    %c0_25 = arith.constant 0 : index
    %35 = vector.load %arg10[%c0_24, %c0_25] : memref<8x128xf32, #tpu.memory_space<vmem>>, vector<8x128xf32>
    %c0_26 = arith.constant 0 : index
    %c0_27 = arith.constant 0 : index
    %36 = vector.load %arg11[%c0_26, %c0_27] : memref<8x128xf32, #tpu.memory_space<vmem>>, vector<8x128xf32>
    %c0_28 = arith.constant 0 : index
    %c0_29 = arith.constant 0 : index
    %37 = vector.load %arg12[%c0_28, %c0_29] : memref<4x8xf32, #tpu.memory_space<vmem>>, vector<4x8xf32>
    %c0_30 = arith.constant 0 : index
    %c0_31 = arith.constant 0 : index
    %38 = vector.load %arg13[%c0_30, %c0_31] : memref<8x4xf32, #tpu.memory_space<vmem>>, vector<8x4xf32>
    %c0_32 = arith.constant 0 : index
    %c0_33 = arith.constant 0 : index
    %39 = vector.load %arg14[%c0_32, %c0_33] : memref<4x128xf32, #tpu.memory_space<vmem>>, vector<4x128xf32>
    %c0_34 = arith.constant 0 : index
    %c0_35 = arith.constant 0 : index
    %40 = vector.load %arg15[%c0_34, %c0_35] : memref<4x128xf32, #tpu.memory_space<vmem>>, vector<4x128xf32>
    %c1 = arith.constant 1 : index
    %c0_36 = arith.constant 0 : index
    %c0_37 = arith.constant 0 : index
    %41 = vector.load %arg2[%c1, %c0_36, %c0_37] : memref<5x4x128xf32, #tpu.memory_space<vmem>>, vector<1x4x128xf32>
    %42 = vector.shape_cast %41 : vector<1x4x128xf32> to vector<4x128xf32>
    %43 = vector.shape_cast %36 : vector<8x128xf32> to vector<1x8x128xf32>
    %44 = vector.broadcast %43 : vector<1x8x128xf32> to vector<4x8x128xf32>
    "tpu.trace_start"() <{level = 10 : i32, message = "byx,bxd->byd"}> : () -> ()
    %cst_38 = arith.constant dense<0.000000e+00> : vector<4x8x128xf32>
    %45 = tpu.matmul %25, %44, %cst_38 {dimension_numbers = #tpu.dot_dimension_numbers<[2], [1], [1], [2], [0, 0, 0, 1, 1, 2], [0], [0]>} : vector<4x8x8xf32>, vector<4x8x128xf32>, vector<4x8x128xf32> -> vector<4x8x128xf32>
    "tpu.trace_stop"() : () -> ()
    %46 = vector.shape_cast %35 : vector<8x128xf32> to vector<1x8x128xf32>
    %47 = vector.broadcast %46 : vector<1x8x128xf32> to vector<4x8x128xf32>
    %48 = arith.mulf %45, %47 : vector<4x8x128xf32>
    %cst_39 = arith.constant dense<0.000000e+00> : vector<4x128xf32>
    %49 = vector.multi_reduction <add>, %48, %cst_39 [1] : vector<4x8x128xf32> to vector<4x128xf32>
    %50 = arith.mulf %42, %49 : vector<4x128xf32>
    %51 = arith.addf %34, %50 : vector<4x128xf32>
    %52 = vector.shape_cast %38 : vector<8x4xf32> to vector<1x8x4xf32>
    %53 = vector.broadcast %52 : vector<1x8x4xf32> to vector<4x8x4xf32>
    "tpu.trace_start"() <{level = 10 : i32, message = "byx,bxj->byj"}> : () -> ()
    %cst_40 = arith.constant dense<0.000000e+00> : vector<4x8x4xf32>
    %54 = tpu.matmul %25, %53, %cst_40 {dimension_numbers = #tpu.dot_dimension_numbers<[2], [1], [1], [2], [0, 0, 0, 1, 1, 2], [0], [0]>} : vector<4x8x8xf32>, vector<4x8x4xf32>, vector<4x8x4xf32> -> vector<4x8x4xf32>
    "tpu.trace_stop"() : () -> ()
    %55 = vector.shape_cast %37 : vector<4x8xf32> to vector<1x4x8xf32>
    %56 = vector.broadcast %55 : vector<1x4x8xf32> to vector<4x4x8xf32>
    "tpu.trace_start"() <{level = 10 : i32, message = "biy,byj->bij"}> : () -> ()
    %cst_41 = arith.constant dense<0.000000e+00> : vector<4x4x4xf32>
    %57 = tpu.matmul %56, %54, %cst_41 {dimension_numbers = #tpu.dot_dimension_numbers<[2], [1], [1], [2], [0, 0, 0, 1, 1, 2], [0], [0]>} : vector<4x4x8xf32>, vector<4x8x4xf32>, vector<4x4x4xf32> -> vector<4x4x4xf32>
    "tpu.trace_stop"() : () -> ()
    %58 = vector.shape_cast %40 : vector<4x128xf32> to vector<1x4x128xf32>
    %59 = vector.broadcast %58 : vector<1x4x128xf32> to vector<4x4x128xf32>
    "tpu.trace_start"() <{level = 10 : i32, message = "byx,bxd->byd"}> : () -> ()
    %cst_42 = arith.constant dense<0.000000e+00> : vector<4x4x128xf32>
    %60 = tpu.matmul %57, %59, %cst_42 {dimension_numbers = #tpu.dot_dimension_numbers<[2], [1], [1], [2], [0, 0, 0, 1, 1, 2], [0], [0]>} : vector<4x4x4xf32>, vector<4x4x128xf32>, vector<4x4x128xf32> -> vector<4x4x128xf32>
    "tpu.trace_stop"() : () -> ()
    %61 = vector.shape_cast %39 : vector<4x128xf32> to vector<1x4x128xf32>
    %62 = vector.broadcast %61 : vector<1x4x128xf32> to vector<4x4x128xf32>
    %63 = arith.mulf %60, %62 : vector<4x4x128xf32>
    %cst_43 = arith.constant dense<0.000000e+00> : vector<4x128xf32>
    %64 = vector.multi_reduction <add>, %63, %cst_43 [1] : vector<4x4x128xf32> to vector<4x128xf32>
    %65 = arith.mulf %42, %64 : vector<4x128xf32>
    %66 = arith.subf %51, %65 : vector<4x128xf32>
    %c0_44 = arith.constant 0 : index
    %c0_45 = arith.constant 0 : index
    %67 = vector.load %arg16[%c0_44, %c0_45] : memref<4x128xf32, #tpu.memory_space<vmem>>, vector<4x128xf32>
    %c0_46 = arith.constant 0 : index
    %c0_47 = arith.constant 0 : index
    %68 = vector.load %arg17[%c0_46, %c0_47] : memref<4x128xf32, #tpu.memory_space<vmem>>, vector<4x128xf32>
    %c0_48 = arith.constant 0 : index
    %c0_49 = arith.constant 0 : index
    %69 = vector.load %arg18[%c0_48, %c0_49] : memref<2x4xf32, #tpu.memory_space<vmem>>, vector<2x4xf32>
    %c0_50 = arith.constant 0 : index
    %c0_51 = arith.constant 0 : index
    %70 = vector.load %arg19[%c0_50, %c0_51] : memref<4x2xf32, #tpu.memory_space<vmem>>, vector<4x2xf32>
    %c0_52 = arith.constant 0 : index
    %c0_53 = arith.constant 0 : index
    %71 = vector.load %arg20[%c0_52, %c0_53] : memref<2x128xf32, #tpu.memory_space<vmem>>, vector<2x128xf32>
    %c0_54 = arith.constant 0 : index
    %c0_55 = arith.constant 0 : index
    %72 = vector.load %arg21[%c0_54, %c0_55] : memref<2x128xf32, #tpu.memory_space<vmem>>, vector<2x128xf32>
    %c2 = arith.constant 2 : index
    %c0_56 = arith.constant 0 : index
    %c0_57 = arith.constant 0 : index
    %73 = vector.load %arg2[%c2, %c0_56, %c0_57] : memref<5x4x128xf32, #tpu.memory_space<vmem>>, vector<1x4x128xf32>
    %74 = vector.shape_cast %73 : vector<1x4x128xf32> to vector<4x128xf32>
    %75 = vector.shape_cast %68 : vector<4x128xf32> to vector<1x4x128xf32>
    %76 = vector.broadcast %75 : vector<1x4x128xf32> to vector<4x4x128xf32>
    "tpu.trace_start"() <{level = 10 : i32, message = "byx,bxd->byd"}> : () -> ()
    %cst_58 = arith.constant dense<0.000000e+00> : vector<4x4x128xf32>
    %77 = tpu.matmul %57, %76, %cst_58 {dimension_numbers = #tpu.dot_dimension_numbers<[2], [1], [1], [2], [0, 0, 0, 1, 1, 2], [0], [0]>} : vector<4x4x4xf32>, vector<4x4x128xf32>, vector<4x4x128xf32> -> vector<4x4x128xf32>
    "tpu.trace_stop"() : () -> ()
    %78 = vector.shape_cast %67 : vector<4x128xf32> to vector<1x4x128xf32>
    %79 = vector.broadcast %78 : vector<1x4x128xf32> to vector<4x4x128xf32>
    %80 = arith.mulf %77, %79 : vector<4x4x128xf32>
    %cst_59 = arith.constant dense<0.000000e+00> : vector<4x128xf32>
    %81 = vector.multi_reduction <add>, %80, %cst_59 [1] : vector<4x4x128xf32> to vector<4x128xf32>
    %82 = arith.mulf %74, %81 : vector<4x128xf32>
    %83 = arith.addf %66, %82 : vector<4x128xf32>
    %84 = vector.shape_cast %70 : vector<4x2xf32> to vector<1x4x2xf32>
    %85 = vector.broadcast %84 : vector<1x4x2xf32> to vector<4x4x2xf32>
    "tpu.trace_start"() <{level = 10 : i32, message = "byx,bxj->byj"}> : () -> ()
    %cst_60 = arith.constant dense<0.000000e+00> : vector<4x4x2xf32>
    %86 = tpu.matmul %57, %85, %cst_60 {dimension_numbers = #tpu.dot_dimension_numbers<[2], [1], [1], [2], [0, 0, 0, 1, 1, 2], [0], [0]>} : vector<4x4x4xf32>, vector<4x4x2xf32>, vector<4x4x2xf32> -> vector<4x4x2xf32>
    "tpu.trace_stop"() : () -> ()
    %87 = vector.shape_cast %69 : vector<2x4xf32> to vector<1x2x4xf32>
    %88 = vector.broadcast %87 : vector<1x2x4xf32> to vector<4x2x4xf32>
    "tpu.trace_start"() <{level = 10 : i32, message = "biy,byj->bij"}> : () -> ()
    %cst_61 = arith.constant dense<0.000000e+00> : vector<4x2x2xf32>
    %89 = tpu.matmul %88, %86, %cst_61 {dimension_numbers = #tpu.dot_dimension_numbers<[2], [1], [1], [2], [0, 0, 0, 1, 1, 2], [0], [0]>} : vector<4x2x4xf32>, vector<4x4x2xf32>, vector<4x2x2xf32> -> vector<4x2x2xf32>
    "tpu.trace_stop"() : () -> ()
    %90 = vector.shape_cast %72 : vector<2x128xf32> to vector<1x2x128xf32>
    %91 = vector.broadcast %90 : vector<1x2x128xf32> to vector<4x2x128xf32>
    "tpu.trace_start"() <{level = 10 : i32, message = "byx,bxd->byd"}> : () -> ()
    %cst_62 = arith.constant dense<0.000000e+00> : vector<4x2x128xf32>
    %92 = tpu.matmul %89, %91, %cst_62 {dimension_numbers = #tpu.dot_dimension_numbers<[2], [1], [1], [2], [0, 0, 0, 1, 1, 2], [0], [0]>} : vector<4x2x2xf32>, vector<4x2x128xf32>, vector<4x2x128xf32> -> vector<4x2x128xf32>
    "tpu.trace_stop"() : () -> ()
    %93 = vector.shape_cast %71 : vector<2x128xf32> to vector<1x2x128xf32>
    %94 = vector.broadcast %93 : vector<1x2x128xf32> to vector<4x2x128xf32>
    %95 = arith.mulf %92, %94 : vector<4x2x128xf32>
    %cst_63 = arith.constant dense<0.000000e+00> : vector<4x128xf32>
    %96 = vector.multi_reduction <add>, %95, %cst_63 [1] : vector<4x2x128xf32> to vector<4x128xf32>
    %97 = arith.mulf %74, %96 : vector<4x128xf32>
    %98 = arith.subf %83, %97 : vector<4x128xf32>
    %c0_64 = arith.constant 0 : index
    %c0_65 = arith.constant 0 : index
    %99 = vector.load %arg22[%c0_64, %c0_65] : memref<2x128xf32, #tpu.memory_space<vmem>>, vector<2x128xf32>
    %c0_66 = arith.constant 0 : index
    %c0_67 = arith.constant 0 : index
    %100 = vector.load %arg23[%c0_66, %c0_67] : memref<2x128xf32, #tpu.memory_space<vmem>>, vector<2x128xf32>
    %c0_68 = arith.constant 0 : index
    %c0_69 = arith.constant 0 : index
    %101 = vector.load %arg24[%c0_68, %c0_69] : memref<1x2xf32, #tpu.memory_space<vmem>>, vector<1x2xf32>
    %c0_70 = arith.constant 0 : index
    %c0_71 = arith.constant 0 : index
    %102 = vector.load %arg25[%c0_70, %c0_71] : memref<2x1xf32, #tpu.memory_space<vmem>>, vector<2x1xf32>
    %c0_72 = arith.constant 0 : index
    %c0_73 = arith.constant 0 : index
    %103 = vector.load %arg26[%c0_72, %c0_73] : memref<1x128xf32, #tpu.memory_space<vmem>>, vector<1x128xf32>
    %c0_74 = arith.constant 0 : index
    %c0_75 = arith.constant 0 : index
    %104 = vector.load %arg27[%c0_74, %c0_75] : memref<1x128xf32, #tpu.memory_space<vmem>>, vector<1x128xf32>
    %c3 = arith.constant 3 : index
    %c0_76 = arith.constant 0 : index
    %c0_77 = arith.constant 0 : index
    %105 = vector.load %arg2[%c3, %c0_76, %c0_77] : memref<5x4x128xf32, #tpu.memory_space<vmem>>, vector<1x4x128xf32>
    %106 = vector.shape_cast %105 : vector<1x4x128xf32> to vector<4x128xf32>
    %107 = vector.shape_cast %100 : vector<2x128xf32> to vector<1x2x128xf32>
    %108 = vector.broadcast %107 : vector<1x2x128xf32> to vector<4x2x128xf32>
    "tpu.trace_start"() <{level = 10 : i32, message = "byx,bxd->byd"}> : () -> ()
    %cst_78 = arith.constant dense<0.000000e+00> : vector<4x2x128xf32>
    %109 = tpu.matmul %89, %108, %cst_78 {dimension_numbers = #tpu.dot_dimension_numbers<[2], [1], [1], [2], [0, 0, 0, 1, 1, 2], [0], [0]>} : vector<4x2x2xf32>, vector<4x2x128xf32>, vector<4x2x128xf32> -> vector<4x2x128xf32>
    "tpu.trace_stop"() : () -> ()
    %110 = vector.shape_cast %99 : vector<2x128xf32> to vector<1x2x128xf32>
    %111 = vector.broadcast %110 : vector<1x2x128xf32> to vector<4x2x128xf32>
    %112 = arith.mulf %109, %111 : vector<4x2x128xf32>
    %cst_79 = arith.constant dense<0.000000e+00> : vector<4x128xf32>
    %113 = vector.multi_reduction <add>, %112, %cst_79 [1] : vector<4x2x128xf32> to vector<4x128xf32>
    %114 = arith.mulf %106, %113 : vector<4x128xf32>
    %115 = arith.addf %98, %114 : vector<4x128xf32>
    %116 = vector.shape_cast %102 : vector<2x1xf32> to vector<1x2x1xf32>
    %117 = vector.broadcast %116 : vector<1x2x1xf32> to vector<4x2x1xf32>
    "tpu.trace_start"() <{level = 10 : i32, message = "byx,bxj->byj"}> : () -> ()
    %cst_80 = arith.constant dense<0.000000e+00> : vector<4x2x1xf32>
    %118 = tpu.matmul %89, %117, %cst_80 {dimension_numbers = #tpu.dot_dimension_numbers<[2], [1], [1], [2], [0, 0, 0, 1, 1, 2], [0], [0]>} : vector<4x2x2xf32>, vector<4x2x1xf32>, vector<4x2x1xf32> -> vector<4x2x1xf32>
    "tpu.trace_stop"() : () -> ()
    %119 = vector.shape_cast %101 : vector<1x2xf32> to vector<1x1x2xf32>
    %120 = vector.broadcast %119 : vector<1x1x2xf32> to vector<4x1x2xf32>
    "tpu.trace_start"() <{level = 10 : i32, message = "biy,byj->bij"}> : () -> ()
    %cst_81 = arith.constant dense<0.000000e+00> : vector<4x1x1xf32>
    %121 = tpu.matmul %120, %118, %cst_81 {dimension_numbers = #tpu.dot_dimension_numbers<[2], [1], [1], [2], [0, 0, 0, 1, 1, 2], [0], [0]>} : vector<4x1x2xf32>, vector<4x2x1xf32>, vector<4x1x1xf32> -> vector<4x1x1xf32>
    "tpu.trace_stop"() : () -> ()
    %122 = vector.shape_cast %104 : vector<1x128xf32> to vector<1x1x128xf32>
    %123 = vector.broadcast %122 : vector<1x1x128xf32> to vector<4x1x128xf32>
    "tpu.trace_start"() <{level = 10 : i32, message = "byx,bxd->byd"}> : () -> ()
    %cst_82 = arith.constant dense<0.000000e+00> : vector<4x1x128xf32>
    %124 = tpu.matmul %121, %123, %cst_82 {dimension_numbers = #tpu.dot_dimension_numbers<[2], [1], [1], [2], [0, 0, 0, 1, 1, 2], [0], [0]>} : vector<4x1x1xf32>, vector<4x1x128xf32>, vector<4x1x128xf32> -> vector<4x1x128xf32>
    "tpu.trace_stop"() : () -> ()
    %125 = vector.shape_cast %103 : vector<1x128xf32> to vector<1x1x128xf32>
    %126 = vector.broadcast %125 : vector<1x1x128xf32> to vector<4x1x128xf32>
    %127 = arith.mulf %124, %126 : vector<4x1x128xf32>
    %cst_83 = arith.constant dense<0.000000e+00> : vector<4x128xf32>
    %128 = vector.multi_reduction <add>, %127, %cst_83 [1] : vector<4x1x128xf32> to vector<4x128xf32>
    %129 = arith.mulf %106, %128 : vector<4x128xf32>
    %130 = arith.subf %115, %129 : vector<4x128xf32>
    %c0_84 = arith.constant 0 : index
    %c0_85 = arith.constant 0 : index
    %131 = vector.load %arg28[%c0_84, %c0_85] : memref<1x128xf32, #tpu.memory_space<vmem>>, vector<1x128xf32>
    %c0_86 = arith.constant 0 : index
    %c0_87 = arith.constant 0 : index
    %132 = vector.load %arg29[%c0_86, %c0_87] : memref<1x128xf32, #tpu.memory_space<vmem>>, vector<1x128xf32>
    %c4 = arith.constant 4 : index
    %c0_88 = arith.constant 0 : index
    %c0_89 = arith.constant 0 : index
    %133 = vector.load %arg2[%c4, %c0_88, %c0_89] : memref<5x4x128xf32, #tpu.memory_space<vmem>>, vector<1x4x128xf32>
    %134 = vector.shape_cast %133 : vector<1x4x128xf32> to vector<4x128xf32>
    %135 = vector.shape_cast %132 : vector<1x128xf32> to vector<1x1x128xf32>
    %136 = vector.broadcast %135 : vector<1x1x128xf32> to vector<4x1x128xf32>
    "tpu.trace_start"() <{level = 10 : i32, message = "byx,bxd->byd"}> : () -> ()
    %cst_90 = arith.constant dense<0.000000e+00> : vector<4x1x128xf32>
    %137 = tpu.matmul %121, %136, %cst_90 {dimension_numbers = #tpu.dot_dimension_numbers<[2], [1], [1], [2], [0, 0, 0, 1, 1, 2], [0], [0]>} : vector<4x1x1xf32>, vector<4x1x128xf32>, vector<4x1x128xf32> -> vector<4x1x128xf32>
    "tpu.trace_stop"() : () -> ()
    %138 = vector.shape_cast %131 : vector<1x128xf32> to vector<1x1x128xf32>
    %139 = vector.broadcast %138 : vector<1x1x128xf32> to vector<4x1x128xf32>
    %140 = arith.mulf %137, %139 : vector<4x1x128xf32>
    %cst_91 = arith.constant dense<0.000000e+00> : vector<4x128xf32>
    %141 = vector.multi_reduction <add>, %140, %cst_91 [1] : vector<4x1x128xf32> to vector<4x128xf32>
    %142 = arith.mulf %134, %141 : vector<4x128xf32>
    %143 = arith.addf %130, %142 : vector<4x128xf32>
    %c0_92 = arith.constant 0 : index
    %c0_93 = arith.constant 0 : index
    %144 = vector.load %arg3[%c0_92, %c0_93] : memref<1x4xf32, #tpu.memory_space<vmem>>, vector<1x4xf32>
    %cst_94 = arith.constant dense<0.000000e+00> : vector<1x128xf32>
    %145 = tpu.matmul %144, %143, %cst_94 {dimension_numbers = #tpu.dot_dimension_numbers<[1], [0], [0], [1], [0, 0, 1, 1], [], []>} : vector<1x4xf32>, vector<4x128xf32>, vector<1x128xf32> -> vector<1x128xf32>
    %c0_95 = arith.constant 0 : index
    %c0_96 = arith.constant 0 : index
    %c0_97 = arith.constant 0 : index
    %146 = vector.load %arg30[%c0_95, %c0_96, %c0_97] : memref<1x1x128xf32, #tpu.memory_space<vmem>>, vector<1x1x128xf32>
    %147 = vector.shape_cast %146 : vector<1x1x128xf32> to vector<1x128xf32>
    %148 = vector.shape_cast %145 : vector<1x128xf32> to vector<1x1x128xf32>
    tpu.vector_store %arg30[%c0_95, %c0_96, %c0_97], %148 {strides = array<i32>} : memref<1x1x128xf32, #tpu.memory_space<vmem>>, vector<1x1x128xf32>,
    return
  }
  func.func @transform_0(%arg0: i32) -> (i32, i32, i32, i32) {
    %c0_i32 = arith.constant 0 : i32
    %c0_i32_0 = arith.constant 0 : i32
    %c0_i32_1 = arith.constant 0 : i32
    %c0_i32_2 = arith.constant 0 : i32
    return %arg0, %c0_i32, %c0_i32_0, %c0_i32_1 : i32, i32, i32, i32
  }
  func.func @transform_1(%arg0: i32) -> (i32, i32, i32) {
    %c0_i32 = arith.constant 0 : i32
    %c0_i32_0 = arith.constant 0 : i32
    %c0_i32_1 = arith.constant 0 : i32
    %c0_i32_2 = arith.constant 0 : i32
    return %c0_i32, %c0_i32_0, %c0_i32_1 : i32, i32, i32
  }
  func.func @transform_2(%arg0: i32) -> (i32, i32) {
    %c0_i32 = arith.constant 0 : i32
    %c0_i32_0 = arith.constant 0 : i32
    %c0_i32_1 = arith.constant 0 : i32
    return %c0_i32, %c0_i32_0 : i32, i32
  }
  func.func @transform_3(%arg0: i32) -> (i32, i32) {
    %c0_i32 = arith.constant 0 : i32
    %c0_i32_0 = arith.constant 0 : i32
    %c0_i32_1 = arith.constant 0 : i32
    return %c0_i32, %c0_i32_0 : i32, i32
  }
  func.func @transform_4(%arg0: i32) -> (i32, i32) {
    %c0_i32 = arith.constant 0 : i32
    %c0_i32_0 = arith.constant 0 : i32
    %c0_i32_1 = arith.constant 0 : i32
    return %c0_i32, %c0_i32_0 : i32, i32
  }
  func.func @transform_5(%arg0: i32) -> (i32, i32) {
    %c0_i32 = arith.constant 0 : i32
    %c0_i32_0 = arith.constant 0 : i32
    %c0_i32_1 = arith.constant 0 : i32
    return %c0_i32, %c0_i32_0 : i32, i32
  }
  func.func @transform_6(%arg0: i32) -> (i32, i32) {
    %c0_i32 = arith.constant 0 : i32
    %c0_i32_0 = arith.constant 0 : i32
    %c0_i32_1 = arith.constant 0 : i32
    return %c0_i32, %c0_i32_0 : i32, i32
  }
  func.func @transform_7(%arg0: i32) -> (i32, i32) {
    %c0_i32 = arith.constant 0 : i32
    %c0_i32_0 = arith.constant 0 : i32
    %c0_i32_1 = arith.constant 0 : i32
    return %c0_i32, %c0_i32_0 : i32, i32
  }
  func.func @transform_8(%arg0: i32) -> (i32, i32) {
    %c0_i32 = arith.constant 0 : i32
    %c0_i32_0 = arith.constant 0 : i32
    %c0_i32_1 = arith.constant 0 : i32
    return %c0_i32, %c0_i32_0 : i32, i32
  }
  func.func @transform_9(%arg0: i32) -> (i32, i32) {
    %c0_i32 = arith.constant 0 : i32
    %c0_i32_0 = arith.constant 0 : i32
    %c0_i32_1 = arith.constant 0 : i32
    return %c0_i32, %c0_i32_0 : i32, i32
  }
  func.func @transform_10(%arg0: i32) -> (i32, i32) {
    %c0_i32 = arith.constant 0 : i32
    %c0_i32_0 = arith.constant 0 : i32
    %c0_i32_1 = arith.constant 0 : i32
    return %c0_i32, %c0_i32_0 : i32, i32
  }
  func.func @transform_11(%arg0: i32) -> (i32, i32) {
    %c0_i32 = arith.constant 0 : i32
    %c0_i32_0 = arith.constant 0 : i32
    %c0_i32_1 = arith.constant 0 : i32
    return %c0_i32, %c0_i32_0 : i32, i32
  }
  func.func @transform_12(%arg0: i32) -> (i32, i32) {
    %c0_i32 = arith.constant 0 : i32
    %c0_i32_0 = arith.constant 0 : i32
    %c0_i32_1 = arith.constant 0 : i32
    return %c0_i32, %c0_i32_0 : i32, i32
  }
  func.func @transform_13(%arg0: i32) -> (i32, i32) {
    %c0_i32 = arith.constant 0 : i32
    %c0_i32_0 = arith.constant 0 : i32
    %c0_i32_1 = arith.constant 0 : i32
    return %c0_i32, %c0_i32_0 : i32, i32
  }
  func.func @transform_14(%arg0: i32) -> (i32, i32) {
    %c0_i32 = arith.constant 0 : i32
    %c0_i32_0 = arith.constant 0 : i32
    %c0_i32_1 = arith.constant 0 : i32
    return %c0_i32, %c0_i32_0 : i32, i32
  }
  func.func @transform_15(%arg0: i32) -> (i32, i32) {
    %c0_i32 = arith.constant 0 : i32
    %c0_i32_0 = arith.constant 0 : i32
    %c0_i32_1 = arith.constant 0 : i32
    return %c0_i32, %c0_i32_0 : i32, i32
  }
  func.func @transform_16(%arg0: i32) -> (i32, i32) {
    %c0_i32 = arith.constant 0 : i32
    %c0_i32_0 = arith.constant 0 : i32
    %c0_i32_1 = arith.constant 0 : i32
    return %c0_i32, %c0_i32_0 : i32, i32
  }
  func.func @transform_17(%arg0: i32) -> (i32, i32) {
    %c0_i32 = arith.constant 0 : i32
    %c0_i32_0 = arith.constant 0 : i32
    %c0_i32_1 = arith.constant 0 : i32
    return %c0_i32, %c0_i32_0 : i32, i32
  }
  func.func @transform_18(%arg0: i32) -> (i32, i32) {
    %c0_i32 = arith.constant 0 : i32
    %c0_i32_0 = arith.constant 0 : i32
    %c0_i32_1 = arith.constant 0 : i32
    return %c0_i32, %c0_i32_0 : i32, i32
  }
  func.func @transform_19(%arg0: i32) -> (i32, i32) {
    %c0_i32 = arith.constant 0 : i32
    %c0_i32_0 = arith.constant 0 : i32
    %c0_i32_1 = arith.constant 0 : i32
    return %c0_i32, %c0_i32_0 : i32, i32
  }
  func.func @transform_20(%arg0: i32) -> (i32, i32) {
    %c0_i32 = arith.constant 0 : i32
    %c0_i32_0 = arith.constant 0 : i32
    %c0_i32_1 = arith.constant 0 : i32
    return %c0_i32, %c0_i32_0 : i32, i32
  }
  func.func @transform_21(%arg0: i32) -> (i32, i32) {
    %c0_i32 = arith.constant 0 : i32
    %c0_i32_0 = arith.constant 0 : i32
    %c0_i32_1 = arith.constant 0 : i32
    return %c0_i32, %c0_i32_0 : i32, i32
  }
  func.func @transform_22(%arg0: i32) -> (i32, i32) {
    %c0_i32 = arith.constant 0 : i32
    %c0_i32_0 = arith.constant 0 : i32
    %c0_i32_1 = arith.constant 0 : i32
    return %c0_i32, %c0_i32_0 : i32, i32
  }
  func.func @transform_23(%arg0: i32) -> (i32, i32) {
    %c0_i32 = arith.constant 0 : i32
    %c0_i32_0 = arith.constant 0 : i32
    %c0_i32_1 = arith.constant 0 : i32
    return %c0_i32, %c0_i32_0 : i32, i32
  }
  func.func @transform_24(%arg0: i32) -> (i32, i32) {
    %c0_i32 = arith.constant 0 : i32
    %c0_i32_0 = arith.constant 0 : i32
    %c0_i32_1 = arith.constant 0 : i32
    return %c0_i32, %c0_i32_0 : i32, i32
  }
  func.func @transform_25(%arg0: i32) -> (i32, i32) {
    %c0_i32 = arith.constant 0 : i32
    %c0_i32_0 = arith.constant 0 : i32
    %c0_i32_1 = arith.constant 0 : i32
    return %c0_i32, %c0_i32_0 : i32, i32
  }
  func.func @transform_26(%arg0: i32) -> (i32, i32) {
    %c0_i32 = arith.constant 0 : i32
    %c0_i32_0 = arith.constant 0 : i32
    %c0_i32_1 = arith.constant 0 : i32
    return %c0_i32, %c0_i32_0 : i32, i32
  }
  func.func @transform_27(%arg0: i32) -> (i32, i32) {
    %c0_i32 = arith.constant 0 : i32
    %c0_i32_0 = arith.constant 0 : i32
    %c0_i32_1 = arith.constant 0 : i32
    return %c0_i32, %c0_i32_0 : i32, i32
  }
  func.func @transform_28(%arg0: i32) -> (i32, i32) {
    %c0_i32 = arith.constant 0 : i32
    %c0_i32_0 = arith.constant 0 : i32
    %c0_i32_1 = arith.constant 0 : i32
    return %c0_i32, %c0_i32_0 : i32, i32
  }
  func.func @transform_29(%arg0: i32) -> (i32, i32, i32) {
    %c0_i32 = arith.constant 0 : i32
    %c0_i32_0 = arith.constant 0 : i32
    %c0_i32_1 = arith.constant 0 : i32
    return %arg0, %c0_i32, %c0_i32_0 : i32, i32, i32
  }
}

</mosaic_0001>

<bundles_post_ra>
// kernel: tpu_custom_call.1
= control target key start
LH: loop header
LB: loop body
LE: loop exit
PB: predicated region body
PF: predicated region fallthrough
CT: control target
= control target key end

     0   :  { %s7567_s6 = smov 1   ;;  %s7568_s10 = smov 2   ;;  %s8396_s0 = inlined_call_operand.smem [shape: u32[30], index: -1, kind: input, shape index: {}] }
   0x1   :  { %s7615_s5 = sld [smem:[%s8396_s0]]   ;;  %s7569_s14 = smov 3  }
   0x2   :  { %s7620_s9 = sld [smem:[%s8396_s0 + %s7567_s6]]   ;;  %s7570_s18 = smov 4  }
   0x3   :  { %s7625_s13 = sld [smem:[%s8396_s0 + %s7568_s10]]   ;;  %s7571_s22 = smov 5  }
   0x4   :  { %s7630_s17 = sld [smem:[%s8396_s0 + %s7569_s14]]   ;;  %s7572_s26 = smov 6  }
   0x5   :  { %s7635_s21 = sld [smem:[%s8396_s0 + %s7570_s18]]   ;;  %s7573_s30 = smov 7  }
   0x6   :  { %s7640_s25 = sld [smem:[%s8396_s0 + %s7571_s22]]   ;;  %s7574_s4 = smov 8  }
   0x7   :  { %8409 = sst [smem:[#allocation16_spill]] %s7615_s5  ;;  %s7575_s10 = smov 9  }
   0x8   :  { %s7645_s29 = sld [smem:[%s8396_s0 + %s7572_s26]]   ;;  %s7576_s15 = smov 10  }
   0x9   :  { %8410 = sst [smem:[#allocation17_spill]] %s7625_s13  ;;  %s7577_s20 = smov 11  }
   0xa   :  { %s7650_s3 = sld [smem:[%s8396_s0 + %s7573_s30]]   ;;  %s7578_s26 = smov 12  }
   0xb   :  { %s7655_s8 = sld [smem:[%s8396_s0 + %s7574_s4]]   ;;  %s7579_s1 = smov 13  }
   0xc   :  { %8411 = sst [smem:[#allocation18_spill]] %s7640_s25  ;;  %s7580_s7 = smov 14  }
   0xd   :  { %s7660_s14 = sld [smem:[%s8396_s0 + %s7575_s10]]   ;;  %s7582_s22 = smov 16  }
   0xe   :  { %s7665_s19 = sld [smem:[%s8396_s0 + %s7576_s15]]   ;;  %s7581_s15 = smov 15  }
   0xf   :  { %s7670_s24 = sld [smem:[%s8396_s0 + %s7577_s20]]   ;;  %s7583_s28 = smov 17  }
  0x10   :  { %s7675_s30 = sld [smem:[%s8396_s0 + %s7578_s26]]  }
  0x11   :  { %s7680_s6 = sld [smem:[%s8396_s0 + %s7579_s1]]  }
  0x12   :  { %s7685_s12 = sld [smem:[%s8396_s0 + %s7580_s7]]   ;;  %s7584_s7 = smov 18  }
  0x13   :  { %8412 = sst [smem:[#allocation19_spill]] %s7660_s14 }
  0x14   :  { %8413 = sst [smem:[#allocation20_spill]] %s7665_s19 }
  0x15   :  { %s7690_s20 = sld [smem:[%s8396_s0 + %s7581_s15]]   ;;  %s7585_s15 = smov 19  }
  0x16   :  { %s7695_s27 = sld [smem:[%s8396_s0 + %s7582_s22]]   ;;  %s7586_s22 = smov 20  }
  0x17   :  { %8414 = sst [smem:[#allocation21_spill]] %s7680_s6 }
  0x18   :  { %s7700_s4 = sld [smem:[%s8396_s0 + %s7583_s28]]   ;;  %s7587_s28 = smov 21  }
  0x19   :  { %s7705_s6 = sld [smem:[%s8396_s0 + %s7584_s7]]   ;;  %s7588_s7 = smov 22  }
  0x1b   :  { %8415 = sst [smem:[#allocation22_spill]] %s7690_s20 }
  0x1c   :  { %8416 = sst [smem:[#allocation23_spill]] %s7695_s27 }
  0x1d   :  { %s7710_s20 = sld [smem:[%s8396_s0 + %s7585_s15]]   ;;  %s7589_s15 = smov 23  }
  0x1e   :  { %8417 = sst [smem:[#allocation24_spill]] %s7700_s4 }
  0x1f   :  { %8418 = sst [smem:[#allocation25_spill]] %s7705_s6 }
  0x20   :  { %s7715_s27 = sld [smem:[%s8396_s0 + %s7586_s22]]   ;;  %s7590_s22 = smov 24  }
  0x21   :  { %s7720_s4 = sld [smem:[%s8396_s0 + %s7587_s28]]   ;;  %s7591_s28 = smov 25  }
  0x22   :  { %s7725_s6 = sld [smem:[%s8396_s0 + %s7588_s7]]   ;;  %s7592_s7 = smov 26  }
  0x23   :  { %8419 = sst [smem:[#allocation26_spill]] %s7710_s20 }
  0x24   :  { %s7730_s20 = sld [smem:[%s8396_s0 + %s7589_s15]]   ;;  %s7593_s15 = smov 27  }
  0x26   :  { %8420 = sst [smem:[#allocation27_spill]] %s7715_s27 }
  0x27   :  { %8421 = sst [smem:[#allocation28_spill]] %s7720_s4 }
  0x28   :  { %8422 = sst [smem:[#allocation29_spill]] %s7725_s6 }
  0x29   :  { %s7735_s27 = sld [smem:[%s8396_s0 + %s7590_s22]]   ;;  %s7594_s22 = smov 28  }
  0x2a   :  { %8423 = sst [smem:[#allocation30_spill]] %s7730_s20 }
  0x2b   :  { %s7740_s4 = sld [smem:[%s8396_s0 + %s7591_s28]]   ;;  %s7595_s28 = smov 29  }
  0x2c   :  { %s7745_s6 = sld [smem:[%s8396_s0 + %s7592_s7]]  }
  0x2d   :  { %s7750_s20 = sld [smem:[%s8396_s0 + %s7593_s15]]  }
  0x2f   :  { %8424 = sst [smem:[#allocation31_spill]] %s7735_s27 }
  0x30   :  { %s7755_s27 = sld [smem:[%s8396_s0 + %s7594_s22]]  }
  0x31   :  { %8425 = sst [smem:[#allocation32_spill]] %s7740_s4 }
  0x32   :  { %s7760_s4 = sld [smem:[%s8396_s0 + %s7595_s28]]  }
  0x38   :  { %8426 = sst [smem:[#allocation33_spill]] %s7760_s4 }
  0x39   :  { %64 = vsyncpa [#allocation3], 0 }
  0x3a   :  { %66 = vsyncpa [#allocation3 + $0x1], 0 }
  0x3b   :  { %67 = vsyncpa [#allocation6], 0 }
  0x3c   :  { %68 = vsyncpa [#allocation9], 0 }
  0x3d   :  { %69 = vsyncpa [#allocation4], 0 }
  0x3e   :  { %71 = vsyncpa [#allocation4 + $0x1], 0  ;;  %s7762_s7 = smov 0   ;;  %s7764_s10 = smov 0  }
  0x3f   :  { %s7766_s11 = smov 0   ;;  %s7768_s15 = smov 0  }
  0x40 LB: > { %s8427_s5 = sld [smem:[#allocation16_spill]]  ;;  %s8428_s25 = sld [smem:[#allocation18_spill]]  ;;  %s7553_s7 = sphi %s7762_s7, %s8466_s7   ;;  %s7565_s15 = sphi %s7768_s15, %s8469_s15   ;;  %s7561_s11 = sphi %s7766_s11, %s8468_s11   ;;  %s7557_s10 = sphi %s7764_s10, %s8467_s10  }
  0x41   : > { %s8429_s19 = sld [smem:[#allocation20_spill]]  ;;  %s8430_s14 = sld [smem:[#allocation19_spill]] }
  0x42   : > { %s8431_s13 = sld [smem:[#allocation17_spill]]  ;;  %8432 = sst [smem:[#allocation34_spill]] %s7553_s7 }
  0x43   : > { %s7783_s0 = sadd.s32 4294967295, %s7565_s15   ;;  %s6515_s16 = sadd.s32 4294967294, %s7565_s15  }
  0x44   : > { %p97_p0 = scmp.ne.s32.totalorder %s7557_s10, %s7553_s7  ;;  %p8400_p1 = scmp.eq.s32.totalorder %s7783_s0, 0 }
  0x45   : > { %p715_p3 = scmp.eq.s32.totalorder %s6515_s16, 1  ;;  %p6516_p5 = scmp.ge.s32.totalorder %s7565_s15, 1 }
  0x46   : > { %p7792_p4 = por %p8400_p1, %p97_p0  ;;  %p722_p7 = scmp.lt.s32.totalorder %s7565_s15, 3 }
  0x47   : > { %p7797_p6 = por %p715_p3, %p97_p0  ;;  %s7596_s26 = smov [#allocation5]  }
  0x48   : > { %s8433_s18 = scalar_select %p7792_p4, 1, 0 }
  0x49   : > { %s8434_s22 = scalar_select %p7797_p6, 1, 0 }
  0x4a   : > { %p7802_p8 = pnand %p6516_p5, %p722_p7  ;;  %s738_s28 = sshll.u32 %s7596_s26, 4  ;;  %s739_s28 = int_to_ptr.vmem [resolvable:$true] %s738_s28 }
  0x4b   : > { %8435 = sst [smem:[#allocation35_spill]] %s8434_s22  ;;  %s7597_s1 = smov [#allocation8]  }
  0x4c   : > { %s8436_s23 = scalar_select %p7802_p8, 1, 0 }
  0x4d   : > { %p7248_p10 = pneg %p7802_p8  ;;  %s775_s2 = sshll.u32 %s7597_s1, 4  ;;  %s7815_s2 = int_to_ptr.vmem [resolvable:$true] %s775_s2 }
  0x4e   : > { %s7598_s22 = smov [#allocation7]   ;;  %s7349_s26 = scalar_lea.hbm %s8431_s13, 16 }
  0x4f   : > { %p7811_p11 = pnand %p7248_p10, %p8400_p1  ;;  %s755_s7 = sshll.u32 %s7598_s22, 4  ;;  %s7817_s7 = int_to_ptr.vmem [resolvable:$true] %s755_s7 }
  0x50   : > { %p7350_p12 = scmp.ne.s32.totalorder %s8431_s13, %s7349_s26  ;;  %p7356_p5 = scmp.lt.u32.totalorder %s7349_s26, %s8431_s13 }
  0x51   : > { %p7823_p13 = pneg %p7811_p11 }
  0x53   : > { %p7352_p0 = pnand %p7823_p13, %p7350_p12 }
  0x55   : > { %p7353_p3 = pneg %p7352_p0 }
  0x57   : > { %p7358_p7 = pnand %p7356_p5, %p7353_p3 }
  0x59   : > { %7361 = shalt.err (!%p7358_p7)
}
  0x5a   : > { %s7362_s1 = scalar_lea.vmem %s739_s28, 16  ;;  %s7369_s22 = scalar_lea.vmem %s739_s28, 32 }
  0x5b   : > { %p7363_p10 = scmp.ne.s32.totalorder %s739_s28, %s7362_s1  ;;  %p7370_p2 = scmp.lt.s32.totalorder %s739_s28, %s739_s28 }
  0x5c   : > { %p7371_p6 = scmp.lt.s32.totalorder %s7369_s22, %s7362_s1 }
  0x5d   : > { %p7365_p9 = pnand %p7363_p10, %p7823_p13 }
  0x5e   : > { %p7372_p4 = por %p7371_p6, %p7370_p2 }
  0x5f   : > { %p7366_p1 = pneg %p7365_p9 }
  0x61   : > { %p7373_p8 = pnand %p7372_p4, %p7366_p1 }
  0x63   : > { %7376 = shalt.err (!%p7373_p8)
}
  0x64   : > { %7251 = dma.hbm_to_vmem [thread:$0]  (!%p7811_p11), %s8431_s13, 16, %s739_s28, [#allocation6]  }
  0x65   : > { %s7377_s26 = scalar_lea.hbm %s8430_s14, 128 }
  0x66   : > { %p7378_p12 = scmp.ne.s32.totalorder %s8430_s14, %s7377_s26  ;;  %p7384_p9 = scmp.lt.u32.totalorder %s7377_s26, %s8430_s14 }
  0x68   : > { %p7380_p0 = pnand %p7378_p12, %p7823_p13 }
  0x6a   : > { %p7381_p3 = pneg %p7380_p0 }
  0x6c   : > { %p7386_p5 = pnand %p7384_p9, %p7381_p3 }
  0x6e   : > { %7389 = shalt.err (!%p7386_p5)
}
  0x6f   : > { %s7390_s1 = scalar_lea.vmem %s7815_s2, 128  ;;  %p7398_p6 = scmp.lt.s32.totalorder %s7815_s2, %s7815_s2 }
  0x70   : > { %p7391_p1 = scmp.ne.s32.totalorder %s7815_s2, %s7390_s1  ;;  %p7399_p8 = scmp.lt.s32.totalorder %s7390_s1, %s7390_s1 }
  0x72   : > { %p7393_p2 = pnand %p7391_p1, %p7823_p13  ;;  %p7400_p7 = por %p7399_p8, %p7398_p6 }
  0x74   : > { %p7394_p4 = pneg %p7393_p2 }
  0x76   : > { %p7401_p10 = pnand %p7400_p7, %p7394_p4 }
  0x78   : > { %7404 = shalt.err (!%p7401_p10)
}
  0x79   : > { %7257 = dma.hbm_to_vmem [thread:$0]  (!%p7811_p11), %s8430_s14, 128, %s7815_s2, [#allocation9]  }
  0x7a   : > { %s7405_s28 = scalar_lea.hbm %s8428_s25, 128 }
  0x7b   : > { %p7406_p12 = scmp.ne.s32.totalorder %s8428_s25, %s7405_s28  ;;  %p7412_p9 = scmp.lt.u32.totalorder %s7405_s28, %s8428_s25 }
  0x7d   : > { %p7408_p0 = pnand %p7406_p12, %p7823_p13 }
  0x7f   : > { %p7409_p3 = pneg %p7408_p0 }
  0x81   : > { %p7414_p5 = pnand %p7412_p9, %p7409_p3 }
  0x83   : > { %7417 = shalt.err (!%p7414_p5)
}
  0x84   : > { %s7418_s22 = scalar_lea.vmem %s7817_s7, 128  ;;  %p7426_p6 = scmp.lt.s32.totalorder %s7817_s7, %s7817_s7 }
  0x85   : > { %p7419_p1 = scmp.ne.s32.totalorder %s7817_s7, %s7418_s22  ;;  %p7427_p8 = scmp.lt.s32.totalorder %s7418_s22, %s7418_s22 }
  0x87   : > { %p7421_p2 = pnand %p7419_p1, %p7823_p13  ;;  %p7428_p7 = por %p7427_p8, %p7426_p6 }
  0x89   : > { %p7422_p4 = pneg %p7421_p2 }
  0x8b   : > { %p7429_p10 = pnand %p7428_p7, %p7422_p4 }
  0x8d   : > { %7432 = shalt.err (!%p7429_p10)
}
  0x8e   : > { %7254 = dma.hbm_to_vmem [thread:$0]  (!%p7811_p11), %s8428_s25, 128, %s7817_s7, [#allocation6]  }
  0x8f   : > { %s7599_s2 = smov [#allocation10]   ;;  %s7433_s1 = scalar_lea.hbm %s8429_s19, 128 }
  0x90   : > { %s786_s26 = sshll.u32 %s7599_s2, 4  ;;  %p7434_p12 = scmp.ne.s32.totalorder %s8429_s19, %s7433_s1  ;;  %s787_s26 = int_to_ptr.vmem [resolvable:$true] %s786_s26 }
  0x91   : > { %p7440_p9 = scmp.lt.u32.totalorder %s7433_s1, %s8429_s19 }
  0x92   : > { %p7436_p0 = pnand %p7434_p12, %p7823_p13 }
  0x94   : > { %p7437_p3 = pneg %p7436_p0 }
  0x96   : > { %p7442_p5 = pnand %p7440_p9, %p7437_p3 }
  0x98   : > { %7445 = shalt.err (!%p7442_p5)
}
  0x99   : > { %s7446_s28 = scalar_lea.vmem %s787_s26, 128  ;;  %p7454_p6 = scmp.lt.s32.totalorder %s787_s26, %s787_s26 }
  0x9a   : > { %p7447_p1 = scmp.ne.s32.totalorder %s787_s26, %s7446_s28  ;;  %p7455_p8 = scmp.lt.s32.totalorder %s7446_s28, %s7446_s28 }
  0x9c   : > { %p7449_p2 = pnand %p7447_p1, %p7823_p13  ;;  %p7456_p7 = por %p7455_p8, %p7454_p6 }
  0x9e   : > { %p7450_p4 = pneg %p7449_p2 }
  0xa0   : > { %p7457_p10 = pnand %p7456_p7, %p7450_p4 }
  0xa2   : > { %7460 = shalt.err (!%p7457_p10)
}
  0xa3   : > { %7260 = dma.hbm_to_vmem [thread:$0]  (!%p7811_p11), %s8429_s19, 128, %s787_s26, [#allocation9]  }
  0xa4   : > { %s7876_s4 = sadd.s32 1, %s7565_s15   ;;  %s84_s7 = sadd.s32 1, %s7561_s11 }
  0xa5   : > { %s81_s22 = ssub.s32 %s7565_s15, %s7876_s4  ;;  %p91_p13 = scmp.ne.s32.totalorder %s7561_s11, %s7557_s10 }
  0xa6   : > { %p82_p12 = scmp.eq.s32.totalorder %s81_s22, 0  ;;  %p92_p0 = scmp.eq.s32.totalorder %s7565_s15, 0 }
  0xa7   : > { %p8439_p3 = scmp.eq.s32.totalorder %s7783_s0, 1  ;;  %p7273_p5 = scmp.lt.s32.totalorder %s7565_s15, 2 }
  0xa8   : > { %s7892_s2 = scalar_select %p82_p12, %s7561_s11, %s84_s7  }
  0xa9   : > { %p7886_p9 = por %p8439_p3, %p91_p13  ;;  %p93_p1 = por %p92_p0, %p91_p13 }
  0xaa   : > { %s851_s26 = sand.u32 1, %s7561_s11   ;;  %s6656_s28 = sshll.u32 %s7565_s15, 10 }
  0xab   : > { %s8440_s16 = scalar_select %p7886_p9, 1, 0 }
  0xac   : > { %s6522_s1 = sshll.u32 %s851_s26, 6  ;;  %s7897_s13 = scalar_lea.hbm %s8427_s5, %s6656_s28 }
  0xad   : > { %s855_s22 = scalar_lea.vmem [#allocation2], %s6522_s1  ;;  %p7901_p11 = pnand %p7273_p5, %p93_p1 }
  0xae   : > { %s862_s14 = sshll.u32 %s855_s22, 4  ;;  %s7905_s7 = scalar_lea.sflag [#allocation3], %s851_s26  ;;  %s7899_s14 = int_to_ptr.vmem [resolvable:$true] %s862_s14 }
  0xaf   : > { %s7461_s25 = scalar_lea.hbm %s7897_s13, 1024  ;;  %p7463_p4 = pneg %p7901_p11 }
  0xb0   : > { %p7462_p2 = scmp.ne.s32.totalorder %s7897_s13, %s7461_s25  ;;  %s7466_s1 = scalar_lea.hbm %s8427_s5, 2048 }
  0xb1   : > { %p7467_p7 = scmp.lt.u32.totalorder %s7897_s13, %s8427_s5  ;;  %p7468_p10 = scmp.lt.u32.totalorder %s7466_s1, %s7461_s25 }
  0xb2   : > { %p7464_p6 = pnand %p7463_p4, %p7462_p2  ;;  %p7470_p12 = scmp.lt.u32.totalorder %s7461_s25, %s7897_s13 }
  0xb3   : > { %p7469_p13 = por %p7468_p10, %p7467_p7 }
  0xb4   : > { %p7465_p8 = pneg %p7464_p6 }
  0xb5   : > { %p7471_p0 = por %p7470_p12, %p7469_p13 }
  0xb7   : > { %p7472_p3 = pnand %p7471_p0, %p7465_p8 }
  0xb9   : > { %7475 = shalt.err (!%p7472_p3)
}
  0xba   : > { %s7476_s26 = scalar_lea.vmem %s7899_s14, 1024  ;;  %s7600_s28 = smov [#allocation2]  }
  0xbb   : > { %p7477_p5 = scmp.ne.s32.totalorder %s7899_s14, %s7476_s26  ;;  %s7481_s22 = sshll.u32 %s7600_s28, 4  ;;  %s7482_s22 = int_to_ptr.vmem [resolvable:$false] %s7481_s22 }
  0xbc   : > { %s7483_s5 = scalar_lea.vmem %s7482_s22, 2048  ;;  %p7484_p2 = scmp.lt.s32.totalorder %s7899_s14, %s7482_s22 }
  0xbd   : > { %p7479_p1 = pnand %p7477_p5, %p7463_p4  ;;  %p7485_p6 = scmp.lt.s32.totalorder %s7483_s5, %s7476_s26 }
  0xbf   : > { %p7480_p9 = pneg %p7479_p1  ;;  %p7486_p7 = por %p7485_p6, %p7484_p2 }
  0xc1   : > { %p7487_p10 = pnand %p7486_p7, %p7480_p9 }
  0xc3   : > { %7490 = shalt.err (!%p7487_p10)
}
  0xc4   : > { %s7601_s25 = smov 128   ;;  %s7602_s1 = smov 8  }
  0xc5   : > { %7264 = dma.hbm_to_vmem [thread:$0]  (!%p7901_p11), %s7897_s13, 1024, %s7899_s14, %s7905_s7, %s7601_s25, %s7601_s25, %s7602_s1  }
  0xc6   : > { %p8442_p4 = scmp.ne.s32.totalorder %s8436_s23, 0 }
  0xc7   : > { %s7932_s28 = sand.u32 (!%p8442_p4), 1, %s7557_s10   ;;  %p8443_p9 = scmp.ne.s32.totalorder (!%p8442_p4), %s8433_s18, 0 }
  0xc8   : > { %874 = sbr.rel (%p8442_p4) target bundleno = 2445 (0x98d), region = 136  ;;  %s6526_s5 = sshll.u32 (!%p8442_p4), %s7932_s28, 6 }
  0xc9   : > { %s877_s26 = scalar_lea.sflag (!%p8442_p4), [#allocation3], %s7932_s28  ;;  %s7936_s22 = scalar_lea.vmem (!%p8442_p4), [#allocation2], %s6526_s5 }
  0xcf   : > { %7536 = dma.done.wait (%p8443_p9), %s877_s26, 1024  }
  0xd0   : > { %7538 = vsyncadd (%p8443_p9), %s877_s26, 4294966272  ;;  %p8444_p11 = scmp.eq.s32.totalorder %s7783_s0, 0 }
  0xd2   : > { %7540 = dma.done.wait (%p8444_p11), [#allocation6], 144   ;;  %p8445_p8 = pmov %p8444_p11 }
  0xd4   : > { %7542 = vsyncadd (%p8445_p8), [#allocation6], 4294967152  ;;  %p8446_p13 = pmov %p8445_p8 }
  0xd5   : > { %p8447_p12 = pmov %p8445_p8 }
  0xd6   : > { %7544 = dma.done.wait (%p8446_p13), [#allocation9], 256  }
  0xd7   : > { %7546 = vsyncadd (%p8447_p12), [#allocation9], 4294967040  ;;  %vm988_vm0 = vcmask 130048   ;;  %v980_v0 = vld [vmem:[%s7635_s21] sm:$0xff]  ;;  %v981_v1 = vld [vmem:[%s7635_s21 + $0x8] sm:$0xff]  ;;  %v7603_v14 = vmov 0.0|0.0  }
  0xd8   : > { %v970_v2 = vld [vmem:[%s7936_s22] sm:$0xff]  ;;  %v7184_v3 = vpack.c.bf16 %v981_v1, %v980_v0  ;;  %v972_v4 = vld [vmem:[%s7936_s22 + $0x10] sm:$0xff]  ;;  %v984_v6 = vld [vmem:[%s7645_s29 + $0x8] sm:$0xff]  ;;  %vm7604_vm1 = vmmov 0   ;;  %v7605_v15 = vmov 0.0   ;;  %vm1353_vm2 = vcmask 1041409  }
  0xd9   : > { %6819 = vmatprep.mubr.msk.f32.mxu0 %vm988_vm0, %v970_v2  ;;  %6826 = vmatprep.mubr.msk.f32.mxu1 %vm988_vm0, %v972_v4  ;;  %v983_v5 = vld [vmem:[%s7645_s29] sm:$0xff]  ;;  %v971_v7 = vld [vmem:[%s7936_s22 + $0x8] sm:$0xff]  ;;  %v973_v8 = vld [vmem:[%s7936_s22 + $0x18] sm:$0xff]  ;;  %vm1355_vm3 = vcmask 1042434   ;;  %vm1357_vm4 = vcmask 1043459   ;;  %vm1945_vm5 = vcmask 64512  }
  0xda   : > { %7185 = vmatprep.subr.bf16.mxu0 %v7184_v3  ;;  %7189 = vmatprep.subr.bf16.mxu1 %v7184_v3  ;;  %v974_v9 = vld [vmem:[%s7936_s22 + $0x20] sm:$0xff]  ;;  %v976_v10 = vld [vmem:[%s7936_s22 + $0x30] sm:$0xff]  ;;  %v7200_v11 = vpack.c.bf16 %v984_v6, %v983_v5  ;;  %v975_v12 = vld [vmem:[%s7936_s22 + $0x28] sm:$0xff]  ;;  %s8448_s13 = sld [smem:[#allocation23_spill]]  ;;  %vm3169_vm6 = vcmask 1043456   ;;  %vm3165_vm7 = vcmask 31744  }
  0xdb   : > { %7187 = vmatpush3.bf16.msra.mxu0 %v7184_v3  ;;  %7191 = vmatpush3.bf16.msra.mxu1 %v7184_v3  ;;  %v977_v13 = vld [vmem:[%s7936_s22 + $0x38] sm:$0xff]  ;;  %v979_v16 = vld [vmem:[%s7630_s17 + $0x8] sm:$0xff]  ;;  %v978_v17 = vld [vmem:[%s7630_s17] sm:$0xff]  ;;  %s8449_s14 = sld [smem:[#allocation25_spill]]  ;;  %s8450_s19 = sld [smem:[#allocation21_spill]]  ;;  %vm4419_vm8 = vcmask 1041408  }
  0xdc   : > { %7193 = vmatprep.subr.bf16.mxu0 %v7184_v3  ;;  %7197 = vmatprep.subr.bf16.mxu1 %v7184_v3  ;;  %v982_v60 = vld [vmem:[#allocation7] sm:$0xff]  ;;  %s8451_s18 = sld [smem:[#allocation22_spill]]  ;;  %s8452_s23 = sld [smem:[#allocation24_spill]]  ;;  %vm4415_vm9 = vcmask 15360   ;;  %vm5669_vm10 = vcmask 1040384   ;;  %vm5665_vm11 = vcmask 7168  }
  0xdd   : > { %s8453_s7 = sld [smem:[#allocation27_spill]]  ;;  %s8454_s25 = sld [smem:[#allocation29_spill]] }
  0xde   : > { %6820 = vmatmul.mubr.msk.f32.vlgmr.msra.gmra.mrb[0].mxu0 %vm988_vm0, %v971_v7  ;;  %6827 = vmatmul.mubr.msk.f32.vlgmr.msra.gmra.mrb[0].mxu1 %vm988_vm0, %v973_v8  ;;  %s8455_s1 = sld [smem:[#allocation31_spill]]  ;;  %s8456_s5 = sld [smem:[#allocation26_spill]] }
  0xdf   : > { %7195 = vmatpush3.bf16.msra.mxu0 %v7184_v3  ;;  %7199 = vmatpush3.bf16.msra.mxu1 %v7184_v3  ;;  %s8457_s26 = sld [smem:[#allocation28_spill]]  ;;  %s8458_s22 = sld [smem:[#allocation30_spill]] }
  0xe0   : > { %6833 = vmatprep.mubr.msk.f32.mxu0 %vm988_vm0, %v974_v9  ;;  %6840 = vmatprep.mubr.msk.f32.mxu1 %vm988_vm0, %v976_v10  ;;  %p8461_p3 = scmp.ne.s32.totalorder %s8440_s16, 0 }
  0xe1   : > { %7201 = vmatprep.subr.bf16.mxu0 %v7200_v11  ;;  %7205 = vmatprep.subr.bf16.mxu1 %v7200_v11 }
  0xe2   : > { %6834 = vmatmul.mubr.msk.f32.vlgmr.msra.gmra.mrb[2].mxu0 %vm988_vm0, %v975_v12  ;;  %6841 = vmatmul.mubr.msk.f32.vlgmr.msra.gmra.mrb[2].mxu1 %vm988_vm0, %v977_v13 }
  0xe3   : > { %7203 = vmatpush3.bf16.msra.mxu0 %v7200_v11  ;;  %7207 = vmatpush3.bf16.msra.mxu1 %v7200_v11 }
  0xe4   : > { %6847 = vmatprep.mubr.msk.f32.mxu0 %vm988_vm0, %v970_v2  ;;  %6854 = vmatprep.mubr.msk.f32.mxu1 %vm988_vm0, %v972_v4 }
  0xe5   : > { %7209 = vmatprep.subr.bf16.mxu0 %v7200_v11  ;;  %7213 = vmatprep.subr.bf16.mxu1 %v7200_v11 }
  0xe6   : > { %6848 = vmatmul.mubr.msk.f32.vlgmr.msra.gmra.mrb[4].mxu0 %vm988_vm0, %v971_v7  ;;  %6855 = vmatmul.mubr.msk.f32.vlgmr.msra.gmra.mrb[4].mxu1 %vm988_vm0, %v973_v8 }
  0xe7   : > { %7211 = vmatpush3.bf16.msra.mxu0 %v7200_v11  ;;  %7215 = vmatpush3.bf16.msra.mxu1 %v7200_v11 }
  0xe8   : > { %6861 = vmatprep.mubr.msk.f32.mxu0 %vm988_vm0, %v974_v9  ;;  %6868 = vmatprep.mubr.msk.f32.mxu1 %vm988_vm0, %v976_v10 }
  0xe9   : > { %7216 = vmatprep.subr.bf16.mxu0 %v7603_v14  ;;  %7219 = vmatprep.subr.bf16.mxu1 %v7603_v14 }
  0xea   : > { %6862 = vmatmul.mubr.msk.f32.vlgmr.msra.gmra.mrb[6].mxu0 %vm988_vm0, %v975_v12  ;;  %6869 = vmatmul.mubr.msk.f32.vlgmr.msra.gmra.mrb[6].mxu1 %vm988_vm0, %v977_v13 }
  0xeb   : > { %6875 = vmatprep.mubr.msk.f32.mxu0 %vm7604_vm1, %v7605_v15  ;;  %6882 = vmatprep.mubr.msk.f32.mxu1 %vm7604_vm1, %v7605_v15 }
 0x1b1   : > { %v6821_v18 = vpop.f32.mrb[0].mxu0  ;;  %v6828_v19 = vpop.f32.mrb[0].mxu1 }
 0x1b2   : > { %v1314_v20 = vmul.f32 %v6821_v18, %v979_v16  ;;  %v1316_v21 = vmul.f32 %v6828_v19, %v979_v16  ;;  %v1061_v22 = vpop.f32.mrb[1].mxu0  ;;  %v1142_v23 = vpop.f32.mrb[1].mxu1 }
 0x1b3   : > { %v1313_v24 = vmul.f32 %v1061_v22, %v978_v17  ;;  %v1315_v25 = vmul.f32 %v1142_v23, %v978_v17 }
 0x1b5   : > { %v1321_v26 = vadd.f32 %v1314_v20, %v1313_v24  ;;  %v1328_v27 = vadd.f32 %v1316_v21, %v1315_v25  ;;  %v6835_v28 = vpop.f32.mrb[2].mxu0  ;;  %v6842_v29 = vpop.f32.mrb[2].mxu1  ;;  %v2277_v20 = vld [vmem:[#allocation10] sm:$0xff]  ;;  %v2279_v25 = vld [vmem:[%s7675_s30] sm:$0xff] }
 0x1b6   : > { %v1318_v30 = vmul.f32 %v6835_v28, %v979_v16  ;;  %v1320_v31 = vmul.f32 %v6842_v29, %v979_v16  ;;  %v1223_v32 = vpop.f32.mrb[3].mxu0  ;;  %v1304_v33 = vpop.f32.mrb[3].mxu1 }
 0x1b7   : > { %v1322_v34 = vrot.slane %v1321_v26, 4  ;;  %v1329_v35 = vrot.slane %v1328_v27, 4  ;;  %v1317_v36 = vmul.f32 %v1223_v32, %v978_v17  ;;  %v1319_v37 = vmul.f32 %v1304_v33, %v978_v17 }
 0x1b9   : > { %v1323_v38 = vadd.f32 %v1322_v34, %v1321_v26  ;;  %v1330_v39 = vadd.f32 %v1329_v35, %v1328_v27  ;;  %v1335_v40 = vadd.f32 %v1318_v30, %v1317_v36  ;;  %v1342_v41 = vadd.f32 %v1320_v31, %v1319_v37  ;;  %v6849_v42 = vpop.f32.mrb[4].mxu0  ;;  %v6856_v43 = vpop.f32.mrb[4].mxu1  ;;  %v985_v26 = vld [vmem:[%s7650_s3] sm:$0xff] }
 0x1ba   : > { %v1428_v44 = vpop.f32.mrb[5].mxu0  ;;  %v1503_v45 = vpop.f32.mrb[5].mxu1 }
 0x1bb   : > { %v1324_v46 = vrot.slane %v1323_v38, 2  ;;  %v1331_v47 = vrot.slane %v1330_v39, 2  ;;  %v1336_v48 = vrot.slane %v1335_v40, 4  ;;  %v1343_v49 = vrot.slane %v1342_v41, 4 }
 0x1bc   : > { %v7217_v50 = vpack.c.bf16 %v6849_v42, %v1428_v44  ;;  %v7220_v51 = vpack.c.bf16 %v6856_v43, %v1503_v45  ;;  %v2276_v43 = vld [vmem:[#allocation8] sm:$0xff] }
 0x1bd   : > { %v1325_v52 = vadd.f32 %v1324_v46, %v1323_v38  ;;  %v1332_v53 = vadd.f32 %v1331_v47, %v1330_v39  ;;  %v1337_v54 = vadd.f32 %v1336_v48, %v1335_v40  ;;  %v1344_v55 = vadd.f32 %v1343_v49, %v1342_v41  ;;  %v6863_v56 = vpop.f32.mrb[6].mxu0  ;;  %v6870_v57 = vpop.f32.mrb[6].mxu1 }
 0x1be   : > { %7218 = vmatpush3.bf16.msra.mxu0 %v7217_v50  ;;  %7221 = vmatpush3.bf16.msra.mxu1 %v7220_v51  ;;  %v1578_v58 = vpop.f32.mrb[7].mxu0  ;;  %v1653_v59 = vpop.f32.mrb[7].mxu1 }
 0x1bf   : > { %v1326_v61 = vrot.slane %v1325_v52, 1  ;;  %v1333_v62 = vrot.slane %v1332_v53, 1  ;;  %v1338_v63 = vrot.slane %v1337_v54, 2  ;;  %v1345_v0 = vrot.slane %v1344_v55, 2  ;;  %7222 = vmatprep.subr.bf16.mxu0 %v7603_v14  ;;  %7225 = vmatprep.subr.bf16.mxu1 %v7603_v14  ;;  %v986_v14 = vld [vmem:[%s7655_s8] sm:$0xff] }
 0x1c0   : > { %v7223_v1 = vpack.c.bf16 %v6863_v56, %v1578_v58  ;;  %v7226_v2 = vpack.c.bf16 %v6870_v57, %v1653_v59 }
 0x1c1   : > { %v1327_v3 = vadd.f32 %v1326_v61, %v1325_v52  ;;  %v1334_v4 = vadd.f32 %v1333_v62, %v1332_v53  ;;  %v1339_v5 = vadd.f32 %v1338_v63, %v1337_v54  ;;  %v1346_v6 = vadd.f32 %v1345_v0, %v1344_v55  ;;  %6876 = vmatmul.mubr.msk.f32.vlgmr.msra.gmra.mrb[8].mxu0 %vm988_vm0, %v982_v60 }
 0x1c2   : > { %6883 = vmatmul.mubr.msk.f32.vlgmr.msra.gmra.mrb[8].mxu1 %vm988_vm0, %v982_v60  ;;  %7224 = vmatpush3.bf16.msra.mxu0 %v7223_v1 }
 0x1c3   : > { %v1354_v7 = vsel %vm1353_vm2, %v1334_v4, %v1327_v3  ;;  %v1340_v8 = vrot.slane %v1339_v5, 1  ;;  %v1347_v9 = vrot.slane %v1346_v6, 1  ;;  %7227 = vmatpush3.bf16.msra.mxu1 %v7226_v2  ;;  %6889 = vmatprep.mubr.msk.f32.mxu0 %vm7604_vm1, %v7605_v15 }
 0x1c4   : > { %6896 = vmatprep.mubr.msk.f32.mxu1 %vm7604_vm1, %v7605_v15  ;;  %6899 = vmatprep.subr.mxu0 %v7605_v15 }
 0x1c5   : > { %v1341_v10 = vadd.f32 %v1340_v8, %v1339_v5  ;;  %v1348_v11 = vadd.f32 %v1347_v9, %v1346_v6  ;;  %6890 = vmatmul.mubr.msk.f32.vlgmr.msra.gmra.mrb[10].mxu0 %vm988_vm0, %v982_v60  ;;  %6904 = vmatprep.subr.mxu1 %v7605_v15 }
 0x1c6   : > { %6897 = vmatmul.mubr.msk.f32.vlgmr.msra.gmra.mrb[10].mxu1 %vm988_vm0, %v982_v60  ;;  %6901 = vmatprep.mubr.msk.f32.mxu0 %vm7604_vm1, %v7605_v15 }
 0x1c7   : > { %v1356_v12 = vsel %vm1355_vm3, %v1341_v10, %v1354_v7  ;;  %6906 = vmatprep.mubr.msk.f32.mxu1 %vm7604_vm1, %v7605_v15  ;;  %6900 = vmatpush3.msra.mxu0 %v986_v14 }
 0x1c8   : > { %v8001_v13 = vsel %vm1357_vm4, %v1348_v11, %v1356_v12  ;;  %6905 = vmatpush3.msra.mxu1 %v986_v14  ;;  %6909 = vmatprep.subr.mxu0 %v7605_v15 }
 0x1c9   : > { %6914 = vmatprep.subr.mxu1 %v7605_v15 }
 0x294   : > { %v1731_v16 = vpop.f32.mrb[8].mxu0 }
 0x295   : > { %v1801_v17 = vpop.f32.mrb[8].mxu1  ;;  %v6877_v18 = vpop.f32.mrb[9].mxu0  ;;  %6902 = vmatmul.mubr.msk.f32.vlgmr.msra.gmra.mrb[12].mxu0 %vm1945_vm5, %v1731_v16 }
 0x296   : > { %v6884_v19 = vpop.f32.mrb[9].mxu1  ;;  %6907 = vmatmul.mubr.msk.f32.vlgmr.msra.gmra.mrb[12].mxu1 %vm1945_vm5, %v1801_v17  ;;  %6910 = vmatpush3.msra.mxu0 %v986_v14 }
 0x297   : > { %6911 = vmatprep.mubr.msk.f32.mxu0 %vm7604_vm1, %v7605_v15  ;;  %6915 = vmatpush3.msra.mxu1 %v986_v14 }
 0x298   : > { %v1871_v21 = vpop.f32.mrb[10].mxu0  ;;  %6916 = vmatprep.mubr.msk.f32.mxu1 %vm7604_vm1, %v7605_v15  ;;  %6919 = vmatprep.subr.mxu0 %v7605_v15 }
 0x299   : > { %v1941_v22 = vpop.f32.mrb[10].mxu1  ;;  %v6891_v23 = vpop.f32.mrb[11].mxu0  ;;  %6912 = vmatmul.mubr.msk.f32.vlgmr.msra.gmra.mrb[14].mxu0 %vm1945_vm5, %v1871_v21  ;;  %6924 = vmatprep.subr.mxu1 %v7605_v15 }
 0x29a   : > { %v6898_v24 = vpop.f32.mrb[11].mxu1  ;;  %6917 = vmatmul.mubr.msk.f32.vlgmr.msra.gmra.mrb[14].mxu1 %vm1945_vm5, %v1941_v22  ;;  %6920 = vmatpush3.msra.mxu0 %v2277_v20 }
 0x29b   : > { %6921 = vmatprep.mubr.msk.f32.mxu0 %vm7604_vm1, %v7605_v15  ;;  %6925 = vmatpush3.msra.mxu1 %v2277_v20  ;;  %v987_v24 = vld [vmem:[%s7620_s9] sm:$0xf] }
 0x29c   : > { %6926 = vmatprep.mubr.msk.f32.mxu1 %vm7604_vm1, %v7605_v15  ;;  %6929 = vmatprep.subr.mxu0 %v7605_v15 }
 0x29d   : > { %6922 = vmatmul.mubr.msk.f32.vlgmr.msra.gmra.mrb[16].mxu0 %vm1945_vm5, %v1731_v16  ;;  %6934 = vmatprep.subr.mxu1 %v7605_v15 }
 0x29e   : > { %6927 = vmatmul.mubr.msk.f32.vlgmr.msra.gmra.mrb[16].mxu1 %vm1945_vm5, %v1801_v17  ;;  %6930 = vmatpush3.msra.mxu0 %v2277_v20 }
 0x29f   : > { %6931 = vmatprep.mubr.msk.f32.mxu0 %vm7604_vm1, %v7605_v15  ;;  %6935 = vmatpush3.msra.mxu1 %v2277_v20 }
 0x2a0   : > { %6936 = vmatprep.mubr.msk.f32.mxu1 %vm7604_vm1, %v7605_v15  ;;  %6939 = vmatprep.subr.mxu0 %v7605_v15 }
 0x2a1   : > { %6932 = vmatmul.mubr.msk.f32.vlgmr.msra.gmra.mrb[18].mxu0 %vm1945_vm5, %v1871_v21  ;;  %6944 = vmatprep.subr.mxu1 %v7605_v15 }
 0x2a2   : > { %6937 = vmatmul.mubr.msk.f32.vlgmr.msra.gmra.mrb[18].mxu1 %vm1945_vm5, %v1941_v22  ;;  %6940 = vmatpush3.msra.mxu0 %v2279_v25 }
 0x2a3   : > { %6941 = vmatprep.mubr.msk.f32.mxu0 %vm7604_vm1, %v7605_v15  ;;  %6945 = vmatpush3.msra.mxu1 %v2279_v25 }
 0x2a4   : > { %6946 = vmatprep.mubr.msk.f32.mxu1 %vm7604_vm1, %v7605_v15  ;;  %6949 = vmatprep.subr.mxu0 %v7605_v15 }
 0x2a5   : > { %6942 = vmatmul.mubr.msk.f32.vlgmr.msra.gmra.mrb[20].mxu0 %vm1945_vm5, %v1731_v16  ;;  %6954 = vmatprep.subr.mxu1 %v7605_v15 }
 0x2a6   : > { %6947 = vmatmul.mubr.msk.f32.vlgmr.msra.gmra.mrb[20].mxu1 %vm1945_vm5, %v1801_v17  ;;  %6950 = vmatpush3.msra.mxu0 %v2279_v25  ;;  %v2278_v17 = vld [vmem:[%s7670_s24] sm:$0xf] }
 0x2a7   : > { %6951 = vmatprep.mubr.msk.f32.mxu0 %vm7604_vm1, %v7605_v15  ;;  %6955 = vmatpush3.msra.mxu1 %v2279_v25 }
 0x2a8   : > { %6956 = vmatprep.mubr.msk.f32.mxu1 %vm7604_vm1, %v7605_v15  ;;  %6959 = vmatprep.subr.mxu0 %v7605_v15 }
 0x2a9   : > { %6952 = vmatmul.mubr.msk.f32.vlgmr.msra.gmra.mrb[22].mxu0 %vm1945_vm5, %v1871_v21  ;;  %6964 = vmatprep.subr.mxu1 %v7605_v15 }
 0x2aa   : > { %6957 = vmatmul.mubr.msk.f32.vlgmr.msra.gmra.mrb[22].mxu1 %vm1945_vm5, %v1941_v22  ;;  %6961 = vmatprep.mubr.msk.f32.mxu0 %vm7604_vm1, %v7605_v15 }
 0x2ab   : > { %6966 = vmatprep.mubr.msk.f32.mxu1 %vm7604_vm1, %v7605_v15 }
 0x368   : > { %v2015_v27 = vpop.f32.mrb[12].mxu0 }
 0x369   : > { %v2238_v28 = vmul.f32 %v2015_v27, %v985_v26  ;;  %v2088_v29 = vpop.f32.mrb[12].mxu1  ;;  %v6903_v30 = vpop.f32.mrb[13].mxu0 }
 0x36a   : > { %v2239_v31 = vmul.f32 %v2088_v29, %v985_v26  ;;  %v6908_v32 = vpop.f32.mrb[13].mxu1 }
 0x36b   : > { %v2242_v33 = vrot.slane %v2238_v28, 4 }
 0x36c   : > { %v2248_v34 = vrot.slane %v2239_v31, 4  ;;  %v2161_v35 = vpop.f32.mrb[14].mxu0 }
 0x36d   : > { %v2243_v36 = vadd.f32 %v2242_v33, %v2238_v28  ;;  %v2240_v37 = vmul.f32 %v2161_v35, %v985_v26  ;;  %v2234_v38 = vpop.f32.mrb[14].mxu1  ;;  %v6913_v39 = vpop.f32.mrb[15].mxu0 }
 0x36e   : > { %v2249_v40 = vadd.f32 %v2248_v34, %v2239_v31  ;;  %v2241_v41 = vmul.f32 %v2234_v38, %v985_v26  ;;  %v6918_v42 = vpop.f32.mrb[15].mxu1 }
 0x36f   : > { %v2244_v44 = vrot.slane %v2243_v36, 2  ;;  %v2254_v45 = vrot.slane %v2240_v37, 4 }
 0x370   : > { %v2250_v46 = vrot.slane %v2249_v40, 2  ;;  %v2260_v47 = vrot.slane %v2241_v41, 4  ;;  %v2350_v48 = vpop.f32.mrb[16].mxu0 }
 0x371   : > { %v2245_v49 = vadd.f32 %v2244_v44, %v2243_v36  ;;  %v2255_v50 = vadd.f32 %v2254_v45, %v2240_v37  ;;  %v2564_v51 = vmul.f32 %v2350_v48, %v2276_v43  ;;  %v2420_v52 = vpop.f32.mrb[16].mxu1  ;;  %v6923_v53 = vpop.f32.mrb[17].mxu0  ;;  %v1360_v36 = vmul.f32 %v8001_v13, %v987_v24 }
 0x372   : > { %v2251_v54 = vadd.f32 %v2250_v46, %v2249_v40  ;;  %v2261_v55 = vadd.f32 %v2260_v47, %v2241_v41  ;;  %v2565_v56 = vmul.f32 %v2420_v52, %v2276_v43  ;;  %v6928_v57 = vpop.f32.mrb[17].mxu1  ;;  %v8078_v53 = vld [vmem:[%s7620_s9 + $0x4] sm:$0xf] }
 0x373   : > { %v2246_v58 = vrot.slane %v2245_v49, 1  ;;  %v2256_v59 = vrot.slane %v2255_v50, 2  ;;  %v2568_v60 = vrot.slane %v2564_v51, 4 }
 0x374   : > { %v2252_v61 = vrot.slane %v2251_v54, 1  ;;  %v2262_v62 = vrot.slane %v2261_v55, 2  ;;  %v2574_v63 = vrot.slane %v2565_v56, 4  ;;  %v2490_v0 = vpop.f32.mrb[18].mxu0 }
 0x375   : > { %v2247_v1 = vadd.f32 %v2246_v58, %v2245_v49  ;;  %v2257_v2 = vadd.f32 %v2256_v59, %v2255_v50  ;;  %v2569_v3 = vadd.f32 %v2568_v60, %v2564_v51  ;;  %v2566_v4 = vmul.f32 %v2490_v0, %v2276_v43  ;;  %v2560_v5 = vpop.f32.mrb[18].mxu1  ;;  %v6933_v6 = vpop.f32.mrb[19].mxu0  ;;  %v2281_v59 = vld [vmem:[%s7685_s12] sm:$0xf] }
 0x376   : > { %v2253_v7 = vadd.f32 %v2252_v61, %v2251_v54  ;;  %v2263_v8 = vadd.f32 %v2262_v62, %v2261_v55  ;;  %v2575_v9 = vadd.f32 %v2574_v63, %v2565_v56  ;;  %v2567_v10 = vmul.f32 %v2560_v5, %v2276_v43  ;;  %v6938_v11 = vpop.f32.mrb[19].mxu1  ;;  %v3505_v0 = vld [vmem:[%s8448_s13] sm:$0xf]  ;;  %s8459_s13 = sld [smem:[#allocation32_spill]] }
 0x377   : > { %v2258_v12 = vrot.slane %v2257_v2, 1  ;;  %v2570_v14 = vrot.slane %v2569_v3, 2  ;;  %v2580_v16 = vrot.slane %v2566_v4, 4  ;;  %v3507_v5 = vld [vmem:[%s8449_s14] sm:$0xf]  ;;  %s8460_s14 = sld [smem:[#allocation33_spill]] }
 0x378   : > { %v2270_v18 = vsel %vm1353_vm2, %v2253_v7, %v2247_v1  ;;  %v2264_v19 = vrot.slane %v2263_v8, 1  ;;  %v2576_v20 = vrot.slane %v2575_v9, 2  ;;  %v2586_v21 = vrot.slane %v2567_v10, 4  ;;  %v2668_v22 = vpop.f32.mrb[20].mxu0  ;;  %v2280_v6 = vld [vmem:[%s8450_s19] sm:$0xf] }
 0x379   : > { %v2259_v23 = vadd.f32 %v2258_v12, %v2257_v2  ;;  %v2571_v25 = vadd.f32 %v2570_v14, %v2569_v3  ;;  %v2581_v26 = vadd.f32 %v2580_v16, %v2566_v4  ;;  %v2738_v27 = vpop.f32.mrb[20].mxu1  ;;  %v6943_v28 = vpop.f32.mrb[21].mxu0  ;;  %6960 = vmatpush3.msra.mxu0 %v2668_v22  ;;  %s969_s19 = scalar_lea.vmem [#allocation11], %s7932_s28 }
 0x37a   : > { %v2265_v29 = vadd.f32 %v2264_v19, %v2263_v8  ;;  %v2577_v30 = vadd.f32 %v2576_v20, %v2575_v9  ;;  %v2587_v31 = vadd.f32 %v2586_v21, %v2567_v10  ;;  %v6948_v32 = vpop.f32.mrb[21].mxu1  ;;  %6965 = vmatpush3.msra.mxu1 %v2738_v27  ;;  %6962 = vmatmul.mubr.msk.f32.vlgmr.msra.gmra.mrb[24].mxu0 %vm1945_vm5, %v2278_v17 }
 0x37b   : > { %v2271_v33 = vsel %vm1355_vm3, %v2259_v23, %v2270_v18  ;;  %v2572_v34 = vrot.slane %v2571_v25, 1  ;;  %v2582_v35 = vrot.slane %v2581_v26, 2  ;;  %6967 = vmatmul.mubr.msk.f32.vlgmr.msra.gmra.mrb[24].mxu1 %vm1945_vm5, %v2278_v17  ;;  %6969 = vmatprep.subr.mxu0 %v7605_v15 }
 0x37c   : > { %v2272_v37 = vsel %vm1357_vm4, %v2265_v29, %v2271_v33  ;;  %v2578_v38 = vrot.slane %v2577_v30, 1  ;;  %v2588_v39 = vrot.slane %v2587_v31, 2  ;;  %v2808_v40 = vpop.f32.mrb[22].mxu0  ;;  %6974 = vmatprep.subr.mxu1 %v7605_v15  ;;  %6971 = vmatprep.mubr.msk.f32.mxu0 %vm7604_vm1, %v7605_v15 }
 0x37d   : > { %v2274_v41 = vmul.f32 %v2272_v37, %v987_v24  ;;  %v2573_v42 = vadd.f32 %v2572_v34, %v2571_v25  ;;  %v2583_v43 = vadd.f32 %v2582_v35, %v2581_v26  ;;  %v2878_v44 = vpop.f32.mrb[22].mxu1  ;;  %v6953_v45 = vpop.f32.mrb[23].mxu0  ;;  %6970 = vmatpush3.msra.mxu0 %v2808_v40  ;;  %6976 = vmatprep.mubr.msk.f32.mxu1 %vm7604_vm1, %v7605_v15  ;;  %v3504_v26 = vld [vmem:[%s8451_s18] sm:$0xf]  ;;  %s6382_s18 = sshll.u32 %s969_s19, 4  ;;  %s8355_s18 = int_to_ptr.vmem [resolvable:$true] %s6382_s18 }
 0x37e   : > { %v2579_v13 = vadd.f32 %v2578_v38, %v2577_v30  ;;  %v2589_v46 = vadd.f32 %v2588_v39, %v2587_v31  ;;  %v6958_v47 = vpop.f32.mrb[23].mxu1  ;;  %6975 = vmatpush3.msra.mxu1 %v2878_v44  ;;  %6972 = vmatmul.mubr.msk.f32.vlgmr.msra.gmra.mrb[26].mxu0 %vm1945_vm5, %v2278_v17 }
 0x37f   : > { %v2275_v48 = vsub.f32 %v1360_v36, %v2274_v41  ;;  %v2584_v49 = vrot.slane %v2583_v43, 1  ;;  %6977 = vmatmul.mubr.msk.f32.vlgmr.msra.gmra.mrb[26].mxu1 %vm1945_vm5, %v2278_v17  ;;  %6979 = vmatprep.subr.mxu0 %v7605_v15 }
 0x380   : > { %v2596_v50 = vsel %vm1353_vm2, %v2579_v13, %v2573_v42  ;;  %v2590_v51 = vrot.slane %v2589_v46, 1  ;;  %6984 = vmatprep.subr.mxu1 %v7605_v15  ;;  %6981 = vmatprep.mubr.msk.f32.mxu0 %vm7604_vm1, %v7605_v15 }
 0x381   : > { %v2585_v52 = vadd.f32 %v2584_v49, %v2583_v43  ;;  %6986 = vmatprep.mubr.msk.f32.mxu1 %vm7604_vm1, %v7605_v15  ;;  %6980 = vmatpush3.msk.msra.mxu0 %vm3169_vm6, %v2281_v59 }
 0x382   : > { %v2591_v54 = vadd.f32 %v2590_v51, %v2589_v46  ;;  %6985 = vmatpush3.msk.msra.mxu1 %vm3169_vm6, %v2281_v59  ;;  %6989 = vmatprep.subr.mxu0 %v7605_v15 }
 0x383   : > { %v2597_v55 = vsel %vm1355_vm3, %v2585_v52, %v2596_v50  ;;  %6994 = vmatprep.subr.mxu1 %v7605_v15 }
 0x384   : > { %v2598_v56 = vsel %vm1357_vm4, %v2591_v54, %v2597_v55 }
 0x385   : > { %v2600_v57 = vmul.f32 %v8078_v53, %v2598_v56 }
 0x387   : > { %v8083_v58 = vadd.f32 %v2600_v57, %v2275_v48 }
 0x44d   : > { %v2951_v60 = vpop.f32.mrb[24].mxu0 }
 0x44e   : > { %v3021_v61 = vpop.f32.mrb[24].mxu1  ;;  %v6963_v62 = vpop.f32.mrb[25].mxu0  ;;  %6982 = vmatmul.mubr.msk.f32.vlgmr.msra.gmra.mrb[28].mxu0 %vm3165_vm7, %v2951_v60 }
 0x44f   : > { %v6968_v63 = vpop.f32.mrb[25].mxu1  ;;  %6987 = vmatmul.mubr.msk.f32.vlgmr.msra.gmra.mrb[28].mxu1 %vm3165_vm7, %v3021_v61  ;;  %6990 = vmatpush3.msk.msra.mxu0 %vm3169_vm6, %v2281_v59 }
 0x450   : > { %6991 = vmatprep.mubr.msk.f32.mxu0 %vm7604_vm1, %v7605_v15  ;;  %6995 = vmatpush3.msk.msra.mxu1 %vm3169_vm6, %v2281_v59 }
 0x451   : > { %v3091_v1 = vpop.f32.mrb[26].mxu0  ;;  %6996 = vmatprep.mubr.msk.f32.mxu1 %vm7604_vm1, %v7605_v15  ;;  %6999 = vmatprep.subr.mxu0 %v7605_v15 }
 0x452   : > { %v3161_v2 = vpop.f32.mrb[26].mxu1  ;;  %v6973_v3 = vpop.f32.mrb[27].mxu0  ;;  %6992 = vmatmul.mubr.msk.f32.vlgmr.msra.gmra.mrb[30].mxu0 %vm3165_vm7, %v3091_v1  ;;  %7004 = vmatprep.subr.mxu1 %v7605_v15 }
 0x453   : > { %v6978_v4 = vpop.f32.mrb[27].mxu1  ;;  %6997 = vmatmul.mubr.msk.f32.vlgmr.msra.gmra.mrb[30].mxu1 %vm3165_vm7, %v3161_v2  ;;  %7000 = vmatpush3.msk.msra.mxu0 %vm3169_vm6, %v3505_v0 }
 0x454   : > { %7001 = vmatprep.mubr.msk.f32.mxu0 %vm7604_vm1, %v7605_v15  ;;  %7005 = vmatpush3.msk.msra.mxu1 %vm3169_vm6, %v3505_v0 }
 0x455   : > { %7006 = vmatprep.mubr.msk.f32.mxu1 %vm7604_vm1, %v7605_v15  ;;  %7009 = vmatprep.subr.mxu0 %v7605_v15 }
 0x456   : > { %7002 = vmatmul.mubr.msk.f32.vlgmr.msra.gmra.mrb[32].mxu0 %vm3165_vm7, %v2951_v60  ;;  %7014 = vmatprep.subr.mxu1 %v7605_v15 }
 0x457   : > { %7007 = vmatmul.mubr.msk.f32.vlgmr.msra.gmra.mrb[32].mxu1 %vm3165_vm7, %v3021_v61  ;;  %7010 = vmatpush3.msk.msra.mxu0 %vm3169_vm6, %v3505_v0 }
 0x458   : > { %7011 = vmatprep.mubr.msk.f32.mxu0 %vm7604_vm1, %v7605_v15  ;;  %7015 = vmatpush3.msk.msra.mxu1 %vm3169_vm6, %v3505_v0 }
 0x459   : > { %7016 = vmatprep.mubr.msk.f32.mxu1 %vm7604_vm1, %v7605_v15  ;;  %7019 = vmatprep.subr.mxu0 %v7605_v15 }
 0x45a   : > { %7012 = vmatmul.mubr.msk.f32.vlgmr.msra.gmra.mrb[34].mxu0 %vm3165_vm7, %v3091_v1  ;;  %7024 = vmatprep.subr.mxu1 %v7605_v15 }
 0x45b   : > { %7017 = vmatmul.mubr.msk.f32.vlgmr.msra.gmra.mrb[34].mxu1 %vm3165_vm7, %v3161_v2  ;;  %7020 = vmatpush3.msk.msra.mxu0 %vm3169_vm6, %v3507_v5 }
 0x45c   : > { %7021 = vmatprep.mubr.msk.f32.mxu0 %vm7604_vm1, %v7605_v15  ;;  %7025 = vmatpush3.msk.msra.mxu1 %vm3169_vm6, %v3507_v5 }
 0x45d   : > { %7026 = vmatprep.mubr.msk.f32.mxu1 %vm7604_vm1, %v7605_v15  ;;  %7029 = vmatprep.subr.mxu0 %v7605_v15 }
 0x45e   : > { %7022 = vmatmul.mubr.msk.f32.vlgmr.msra.gmra.mrb[36].mxu0 %vm3165_vm7, %v2951_v60  ;;  %7034 = vmatprep.subr.mxu1 %v7605_v15 }
 0x45f   : > { %7027 = vmatmul.mubr.msk.f32.vlgmr.msra.gmra.mrb[36].mxu1 %vm3165_vm7, %v3021_v61  ;;  %7030 = vmatpush3.msk.msra.mxu0 %vm3169_vm6, %v3507_v5 }
 0x460   : > { %7031 = vmatprep.mubr.msk.f32.mxu0 %vm7604_vm1, %v7605_v15  ;;  %7035 = vmatpush3.msk.msra.mxu1 %vm3169_vm6, %v3507_v5 }
 0x461   : > { %7036 = vmatprep.mubr.msk.f32.mxu1 %vm7604_vm1, %v7605_v15  ;;  %7039 = vmatprep.subr.mxu0 %v7605_v15 }
 0x462   : > { %7032 = vmatmul.mubr.msk.f32.vlgmr.msra.gmra.mrb[38].mxu0 %vm3165_vm7, %v3091_v1  ;;  %7044 = vmatprep.subr.mxu1 %v7605_v15 }
 0x463   : > { %7037 = vmatmul.mubr.msk.f32.vlgmr.msra.gmra.mrb[38].mxu1 %vm3165_vm7, %v3161_v2  ;;  %7041 = vmatprep.mubr.msk.f32.mxu0 %vm7604_vm1, %v7605_v15  ;;  %v3506_v2 = vld [vmem:[%s8452_s23] sm:$0x3]  ;;  %s6653_s23 = sshll.u32 %s7783_s0, 4 }
 0x464   : > { %7046 = vmatprep.mubr.msk.f32.mxu1 %vm7604_vm1, %v7605_v15 }
 0x521   : > { %v3239_v7 = vpop.f32.mrb[28].mxu0 }
 0x522   : > { %v3462_v8 = vmul.f32 %v3239_v7, %v2280_v6  ;;  %v3312_v9 = vpop.f32.mrb[28].mxu1  ;;  %v6983_v10 = vpop.f32.mrb[29].mxu0 }
 0x523   : > { %v3463_v11 = vmul.f32 %v3312_v9, %v2280_v6  ;;  %v6988_v12 = vpop.f32.mrb[29].mxu1 }
 0x524   : > { %v3466_v14 = vsel %vm3169_vm6, %v3462_v8, 0.0 }
 0x525   : > { %v3467_v16 = vrot.slane %v3466_v14, 4  ;;  %v3473_v17 = vsel %vm3169_vm6, %v3463_v11, 0.0  ;;  %v3385_v18 = vpop.f32.mrb[30].mxu0 }
 0x526   : > { %v3474_v19 = vrot.slane %v3473_v17, 4  ;;  %v3464_v20 = vmul.f32 %v3385_v18, %v2280_v6  ;;  %v3458_v21 = vpop.f32.mrb[30].mxu1  ;;  %v6993_v22 = vpop.f32.mrb[31].mxu0 }
 0x527   : > { %v3468_v23 = vadd.f32 %v3467_v16, %v3466_v14  ;;  %v3465_v24 = vmul.f32 %v3458_v21, %v2280_v6  ;;  %v6998_v25 = vpop.f32.mrb[31].mxu1 }
 0x528   : > { %v3475_v27 = vadd.f32 %v3474_v19, %v3473_v17  ;;  %v3480_v28 = vsel %vm3169_vm6, %v3464_v20, 0.0 }
 0x529   : > { %v3469_v29 = vrot.slane %v3468_v23, 2  ;;  %v3481_v30 = vrot.slane %v3480_v28, 4  ;;  %v3487_v31 = vsel %vm3169_vm6, %v3465_v24, 0.0  ;;  %v3581_v32 = vpop.f32.mrb[32].mxu0 }
 0x52a   : > { %v3476_v33 = vrot.slane %v3475_v27, 2  ;;  %v3488_v34 = vrot.slane %v3487_v31, 4  ;;  %v3795_v35 = vmul.f32 %v3581_v32, %v3504_v26  ;;  %v3651_v36 = vpop.f32.mrb[32].mxu1  ;;  %v7003_v37 = vpop.f32.mrb[33].mxu0 }
 0x52b   : > { %v3470_v38 = vadd.f32 %v3469_v29, %v3468_v23  ;;  %v3482_v39 = vadd.f32 %v3481_v30, %v3480_v28  ;;  %v3796_v40 = vmul.f32 %v3651_v36, %v3504_v26  ;;  %v7008_v41 = vpop.f32.mrb[33].mxu1 }
 0x52c   : > { %v3477_v42 = vadd.f32 %v3476_v33, %v3475_v27  ;;  %v3489_v43 = vadd.f32 %v3488_v34, %v3487_v31  ;;  %v3799_v44 = vsel %vm3169_vm6, %v3795_v35, 0.0 }
 0x52d   : > { %v3471_v45 = vrot.slane %v3470_v38, 1  ;;  %v3483_v13 = vrot.slane %v3482_v39, 2  ;;  %v3800_v46 = vrot.slane %v3799_v44, 4  ;;  %v3806_v47 = vsel %vm3169_vm6, %v3796_v40, 0.0  ;;  %v3721_v48 = vpop.f32.mrb[34].mxu0 }
 0x52e   : > { %v3478_v49 = vrot.slane %v3477_v42, 1  ;;  %v3490_v50 = vrot.slane %v3489_v43, 2  ;;  %v3807_v51 = vrot.slane %v3806_v47, 4  ;;  %v3797_v52 = vmul.f32 %v3721_v48, %v3504_v26  ;;  %v3791_v54 = vpop.f32.mrb[34].mxu1  ;;  %v7013_v55 = vpop.f32.mrb[35].mxu0 }
 0x52f   : > { %v3472_v56 = vadd.f32 %v3471_v45, %v3470_v38  ;;  %v3484_v57 = vadd.f32 %v3483_v13, %v3482_v39  ;;  %v3801_v59 = vadd.f32 %v3800_v46, %v3799_v44  ;;  %v3798_v60 = vmul.f32 %v3791_v54, %v3504_v26  ;;  %v7018_v61 = vpop.f32.mrb[35].mxu1  ;;  %v3509_v46 = vld [vmem:[%s8453_s7] sm:$0x3]  ;;  %s8358_s7 = scalar_lea.hbm %s8460_s14, %s6653_s23 }
 0x530   : > { %v3479_v62 = vadd.f32 %v3478_v49, %v3477_v42  ;;  %v3491_v63 = vadd.f32 %v3490_v50, %v3489_v43  ;;  %v3808_v0 = vadd.f32 %v3807_v51, %v3806_v47  ;;  %v3813_v1 = vsel %vm3169_vm6, %v3797_v52, 0.0  ;;  %v8186_v42 = vld [vmem:[%s7620_s9 + $0x8] sm:$0xf]  ;;  %v4755_v51 = vld [vmem:[%s8454_s25] sm:$0x3]  ;;  %s6370_s25 = scalar_lea.sflag [#allocation4], %s7932_s28 }
 0x531   : > { %v3485_v3 = vrot.slane %v3484_v57, 1  ;;  %v3802_v4 = vrot.slane %v3801_v59, 2  ;;  %v3814_v5 = vrot.slane %v3813_v1, 4  ;;  %v3820_v6 = vsel %vm3169_vm6, %v3798_v60, 0.0  ;;  %v3906_v7 = vpop.f32.mrb[36].mxu0 }
 0x532   : > { %v3498_v8 = vsel %vm1353_vm2, %v3479_v62, %v3472_v56  ;;  %v3492_v9 = vrot.slane %v3491_v63, 1  ;;  %v3809_v10 = vrot.slane %v3808_v0, 2  ;;  %v3821_v11 = vrot.slane %v3820_v6, 4  ;;  %v3976_v12 = vpop.f32.mrb[36].mxu1  ;;  %v7023_v14 = vpop.f32.mrb[37].mxu0  ;;  %7040 = vmatpush3.msk.msra.mxu0 %vm3169_vm6, %v3906_v7 }
 0x533   : > { %v3486_v16 = vadd.f32 %v3485_v3, %v3484_v57  ;;  %v3803_v17 = vadd.f32 %v3802_v4, %v3801_v59  ;;  %v3815_v18 = vadd.f32 %v3814_v5, %v3813_v1  ;;  %v7028_v19 = vpop.f32.mrb[37].mxu1  ;;  %7045 = vmatpush3.msk.msra.mxu1 %vm3169_vm6, %v3976_v12  ;;  %7042 = vmatmul.mubr.msk.f32.vlgmr.msra.gmra.mrb[40].mxu0 %vm3165_vm7, %v3506_v2  ;;  %v4757_v57 = vld [vmem:[%s8455_s1] sm:$0x3]  ;;  %s7491_s1 = scalar_lea.vmem %s8355_s18, 16 }
 0x534   : > { %v3493_v20 = vadd.f32 %v3492_v9, %v3491_v63  ;;  %v3810_v21 = vadd.f32 %v3809_v10, %v3808_v0  ;;  %v3822_v22 = vadd.f32 %v3821_v11, %v3820_v6  ;;  %7047 = vmatmul.mubr.msk.f32.vlgmr.msra.gmra.mrb[40].mxu1 %vm3165_vm7, %v3506_v2  ;;  %7049 = vmatprep.subr.mxu0 %v7605_v15  ;;  %v3508_v59 = vld [vmem:[%s8456_s5] sm:$0x3]  ;;  %p7492_p0 = scmp.ne.s32.totalorder %s8355_s18, %s7491_s1  ;;  %s7606_s5 = smov [#allocation11]  }
 0x535   : > { %v3499_v23 = vsel %vm1355_vm3, %v3486_v16, %v3498_v8  ;;  %v3804_v24 = vrot.slane %v3803_v17, 1  ;;  %v3816_v25 = vrot.slane %v3815_v18, 2  ;;  %v4046_v26 = vpop.f32.mrb[38].mxu0  ;;  %7054 = vmatprep.subr.mxu1 %v7605_v15  ;;  %7051 = vmatprep.mubr.msk.f32.mxu0 %vm7604_vm1, %v7605_v15  ;;  %v4754_v14 = vld [vmem:[%s8457_s26] sm:$0x3]  ;;  %s7495_s26 = sshll.u32 %s7606_s5, 4  ;;  %s7496_s26 = int_to_ptr.vmem [resolvable:$false] %s7495_s26 }
 0x536   : > { %v3500_v27 = vsel %vm1357_vm4, %v3493_v20, %v3499_v23  ;;  %v3811_v28 = vrot.slane %v3810_v21, 1  ;;  %v3823_v29 = vrot.slane %v3822_v22, 2  ;;  %v4116_v30 = vpop.f32.mrb[38].mxu1  ;;  %v7033_v31 = vpop.f32.mrb[39].mxu0  ;;  %7050 = vmatpush3.msk.msra.mxu0 %vm3169_vm6, %v4046_v26  ;;  %7056 = vmatprep.mubr.msk.f32.mxu1 %vm7604_vm1, %v7605_v15  ;;  %p7493_p5 = pnand %p7492_p0, %p8461_p3  ;;  %s7497_s0 = scalar_lea.vmem %s7496_s26, 32 }
 0x537   : > { %v3502_v32 = vmul.f32 %v8078_v53, %v3500_v27  ;;  %v3805_v33 = vadd.f32 %v3804_v24, %v3803_v17  ;;  %v3817_v34 = vadd.f32 %v3816_v25, %v3815_v18  ;;  %v7038_v35 = vpop.f32.mrb[39].mxu1  ;;  %7055 = vmatpush3.msk.msra.mxu1 %vm3169_vm6, %v4116_v30  ;;  %7052 = vmatmul.mubr.msk.f32.vlgmr.msra.gmra.mrb[42].mxu0 %vm3165_vm7, %v3506_v2  ;;  %p7498_p2 = scmp.lt.s32.totalorder %s8355_s18, %s7496_s26  ;;  %p7499_p6 = scmp.lt.s32.totalorder %s7497_s0, %s7491_s1 }
 0x538   : > { %v3812_v36 = vadd.f32 %v3811_v28, %v3810_v21  ;;  %v3824_v37 = vadd.f32 %v3823_v29, %v3822_v22  ;;  %7057 = vmatmul.mubr.msk.f32.vlgmr.msra.gmra.mrb[42].mxu1 %vm3165_vm7, %v3506_v2  ;;  %7059 = vmatprep.subr.mxu0 %v7605_v15  ;;  %p7494_p1 = pneg %p7493_p5 }
 0x539   : > { %v3503_v38 = vsub.f32 %v8083_v58, %v3502_v32  ;;  %v3818_v39 = vrot.slane %v3817_v34, 1  ;;  %7064 = vmatprep.subr.mxu1 %v7605_v15  ;;  %7061 = vmatprep.mubr.msk.f32.mxu0 %vm7604_vm1, %v7605_v15  ;;  %p7500_p7 = por %p7499_p6, %p7498_p2 }
 0x53a   : > { %v3831_v53 = vsel %vm1353_vm2, %v3812_v36, %v3805_v33  ;;  %v3825_v40 = vrot.slane %v3824_v37, 1  ;;  %7066 = vmatprep.mubr.msk.f32.mxu1 %vm7604_vm1, %v7605_v15  ;;  %7060 = vmatpush3.msk.msra.mxu0 %vm4419_vm8, %v3509_v46 }
 0x53b   : > { %v3819_v41 = vadd.f32 %v3818_v39, %v3817_v34  ;;  %7065 = vmatpush3.msk.msra.mxu1 %vm4419_vm8, %v3509_v46  ;;  %7069 = vmatprep.subr.mxu0 %v7605_v15  ;;  %p7501_p10 = pnand %p7500_p7, %p7494_p1 }
 0x53c   : > { %v3826_v43 = vadd.f32 %v3825_v40, %v3824_v37  ;;  %7074 = vmatprep.subr.mxu1 %v7605_v15 }
 0x53d   : > { %v3832_v44 = vsel %vm1355_vm3, %v3819_v41, %v3831_v53 }
 0x53e   : > { %v3833_v58 = vsel %vm1357_vm4, %v3826_v43, %v3832_v44 }
 0x53f   : > { %v3835_v45 = vmul.f32 %v8186_v42, %v3833_v58 }
 0x541   : > { %v8191_v13 = vadd.f32 %v3835_v45, %v3503_v38 }
 0x606   : > { %v4192_v47 = vpop.f32.mrb[40].mxu0 }
 0x607   : > { %v4265_v48 = vpop.f32.mrb[40].mxu1  ;;  %v7043_v49 = vpop.f32.mrb[41].mxu0  ;;  %7062 = vmatmul.mubr.msk.f32.vlgmr.msra.gmra.mrb[44].mxu0 %vm4415_vm9, %v4192_v47 }
 0x608   : > { %v7048_v50 = vpop.f32.mrb[41].mxu1  ;;  %7067 = vmatmul.mubr.msk.f32.vlgmr.msra.gmra.mrb[44].mxu1 %vm4415_vm9, %v4265_v48  ;;  %7070 = vmatpush3.msk.msra.mxu0 %vm4419_vm8, %v3509_v46 }
 0x609   : > { %7071 = vmatprep.mubr.msk.f32.mxu0 %vm7604_vm1, %v7605_v15  ;;  %7075 = vmatpush3.msk.msra.mxu1 %vm4419_vm8, %v3509_v46 }
 0x60a   : > { %v4338_v52 = vpop.f32.mrb[42].mxu0  ;;  %7076 = vmatprep.mubr.msk.f32.mxu1 %vm7604_vm1, %v7605_v15  ;;  %7079 = vmatprep.subr.mxu0 %v7605_v15 }
 0x60b   : > { %v4411_v54 = vpop.f32.mrb[42].mxu1  ;;  %v7053_v55 = vpop.f32.mrb[43].mxu0  ;;  %7072 = vmatmul.mubr.msk.f32.vlgmr.msra.gmra.mrb[46].mxu0 %vm4415_vm9, %v4338_v52  ;;  %7084 = vmatprep.subr.mxu1 %v7605_v15 }
 0x60c   : > { %v7058_v56 = vpop.f32.mrb[43].mxu1  ;;  %7077 = vmatmul.mubr.msk.f32.vlgmr.msra.gmra.mrb[46].mxu1 %vm4415_vm9, %v4411_v54  ;;  %7080 = vmatpush3.msk.msra.mxu0 %vm4419_vm8, %v4755_v51 }
 0x60d   : > { %7081 = vmatprep.mubr.msk.f32.mxu0 %vm7604_vm1, %v7605_v15  ;;  %7085 = vmatpush3.msk.msra.mxu1 %vm4419_vm8, %v4755_v51 }
 0x60e   : > { %7086 = vmatprep.mubr.msk.f32.mxu1 %vm7604_vm1, %v7605_v15  ;;  %7089 = vmatprep.subr.mxu0 %v7605_v15 }
 0x60f   : > { %7082 = vmatmul.mubr.msk.f32.vlgmr.msra.gmra.mrb[48].mxu0 %vm4415_vm9, %v4192_v47  ;;  %7094 = vmatprep.subr.mxu1 %v7605_v15 }
 0x610   : > { %7087 = vmatmul.mubr.msk.f32.vlgmr.msra.gmra.mrb[48].mxu1 %vm4415_vm9, %v4265_v48  ;;  %7090 = vmatpush3.msk.msra.mxu0 %vm4419_vm8, %v4755_v51 }
 0x611   : > { %7091 = vmatprep.mubr.msk.f32.mxu0 %vm7604_vm1, %v7605_v15  ;;  %7095 = vmatpush3.msk.msra.mxu1 %vm4419_vm8, %v4755_v51 }
 0x612   : > { %7096 = vmatprep.mubr.msk.f32.mxu1 %vm7604_vm1, %v7605_v15  ;;  %7099 = vmatprep.subr.mxu0 %v7605_v15 }
 0x613   : > { %7092 = vmatmul.mubr.msk.f32.vlgmr.msra.gmra.mrb[50].mxu0 %vm4415_vm9, %v4338_v52  ;;  %7104 = vmatprep.subr.mxu1 %v7605_v15 }
 0x614   : > { %7097 = vmatmul.mubr.msk.f32.vlgmr.msra.gmra.mrb[50].mxu1 %vm4415_vm9, %v4411_v54  ;;  %7100 = vmatpush3.msk.msra.mxu0 %vm4419_vm8, %v4757_v57 }
 0x615   : > { %7101 = vmatprep.mubr.msk.f32.mxu0 %vm7604_vm1, %v7605_v15  ;;  %7105 = vmatpush3.msk.msra.mxu1 %vm4419_vm8, %v4757_v57 }
 0x616   : > { %7106 = vmatprep.mubr.msk.f32.mxu1 %vm7604_vm1, %v7605_v15  ;;  %7109 = vmatprep.subr.mxu0 %v7605_v15 }
 0x617   : > { %7102 = vmatmul.mubr.msk.f32.vlgmr.msra.gmra.mrb[52].mxu0 %vm4415_vm9, %v4192_v47  ;;  %7114 = vmatprep.subr.mxu1 %v7605_v15 }
 0x618   : > { %7107 = vmatmul.mubr.msk.f32.vlgmr.msra.gmra.mrb[52].mxu1 %vm4415_vm9, %v4265_v48  ;;  %7110 = vmatpush3.msk.msra.mxu0 %vm4419_vm8, %v4757_v57 }
 0x619   : > { %7111 = vmatprep.mubr.msk.f32.mxu0 %vm7604_vm1, %v7605_v15  ;;  %7115 = vmatpush3.msk.msra.mxu1 %vm4419_vm8, %v4757_v57 }
 0x61a   : > { %7116 = vmatprep.mubr.msk.f32.mxu1 %vm7604_vm1, %v7605_v15  ;;  %7119 = vmatprep.subr.mxu0 %v7605_v15 }
 0x61b   : > { %7112 = vmatmul.mubr.msk.f32.vlgmr.msra.gmra.mrb[54].mxu0 %vm4415_vm9, %v4338_v52  ;;  %7124 = vmatprep.subr.mxu1 %v7605_v15 }
 0x61c   : > { %7117 = vmatmul.mubr.msk.f32.vlgmr.msra.gmra.mrb[54].mxu1 %vm4415_vm9, %v4411_v54  ;;  %7121 = vmatprep.mubr.msk.f32.mxu0 %vm7604_vm1, %v7605_v15  ;;  %v4756_v54 = vld [vmem:[%s8458_s22] sm:$0x1] }
 0x61d   : > { %7126 = vmatprep.mubr.msk.f32.mxu1 %vm7604_vm1, %v7605_v15 }
 0x6da   : > { %v4489_v60 = vpop.f32.mrb[44].mxu0 }
 0x6db   : > { %v4712_v61 = vmul.f32 %v4489_v60, %v3508_v59  ;;  %v4562_v62 = vpop.f32.mrb[44].mxu1  ;;  %v7063_v63 = vpop.f32.mrb[45].mxu0 }
 0x6dc   : > { %v4713_v0 = vmul.f32 %v4562_v62, %v3508_v59  ;;  %v7068_v1 = vpop.f32.mrb[45].mxu1 }
 0x6dd   : > { %v4716_v2 = vsel %vm4419_vm8, %v4712_v61, 0.0 }
 0x6de   : > { %v4717_v3 = vrot.slane %v4716_v2, 4  ;;  %v4723_v4 = vsel %vm4419_vm8, %v4713_v0, 0.0  ;;  %v4635_v5 = vpop.f32.mrb[46].mxu0 }
 0x6df   : > { %v4724_v6 = vrot.slane %v4723_v4, 4  ;;  %v4714_v7 = vmul.f32 %v4635_v5, %v3508_v59  ;;  %v4708_v8 = vpop.f32.mrb[46].mxu1  ;;  %v7073_v9 = vpop.f32.mrb[47].mxu0 }
 0x6e0   : > { %v4718_v10 = vadd.f32 %v4717_v3, %v4716_v2  ;;  %v4715_v11 = vmul.f32 %v4708_v8, %v3508_v59  ;;  %v7078_v12 = vpop.f32.mrb[47].mxu1 }
 0x6e1   : > { %v4725_v16 = vadd.f32 %v4724_v6, %v4723_v4  ;;  %v4730_v17 = vsel %vm4419_vm8, %v4714_v7, 0.0 }
 0x6e2   : > { %v4719_v18 = vrot.slane %v4718_v10, 2  ;;  %v4731_v19 = vrot.slane %v4730_v17, 4  ;;  %v4737_v20 = vsel %vm4419_vm8, %v4715_v11, 0.0  ;;  %v4831_v21 = vpop.f32.mrb[48].mxu0 }
 0x6e3   : > { %v4726_v22 = vrot.slane %v4725_v16, 2  ;;  %v4738_v23 = vrot.slane %v4737_v20, 4  ;;  %v5045_v24 = vmul.f32 %v4831_v21, %v4754_v14  ;;  %v4901_v25 = vpop.f32.mrb[48].mxu1  ;;  %v7083_v26 = vpop.f32.mrb[49].mxu0 }
 0x6e4   : > { %v4720_v27 = vadd.f32 %v4719_v18, %v4718_v10  ;;  %v4732_v28 = vadd.f32 %v4731_v19, %v4730_v17  ;;  %v5046_v29 = vmul.f32 %v4901_v25, %v4754_v14  ;;  %v7088_v30 = vpop.f32.mrb[49].mxu1 }
 0x6e5   : > { %v4727_v31 = vadd.f32 %v4726_v22, %v4725_v16  ;;  %v4739_v32 = vadd.f32 %v4738_v23, %v4737_v20  ;;  %v5049_v33 = vsel %vm4419_vm8, %v5045_v24, 0.0 }
 0x6e6   : > { %v4721_v34 = vrot.slane %v4720_v27, 1  ;;  %v4733_v35 = vrot.slane %v4732_v28, 2  ;;  %v5050_v36 = vrot.slane %v5049_v33, 4  ;;  %v5056_v37 = vsel %vm4419_vm8, %v5046_v29, 0.0  ;;  %v4971_v38 = vpop.f32.mrb[50].mxu0 }
 0x6e7   : > { %v4728_v39 = vrot.slane %v4727_v31, 1  ;;  %v4740_v53 = vrot.slane %v4739_v32, 2  ;;  %v5057_v40 = vrot.slane %v5056_v37, 4  ;;  %v5047_v41 = vmul.f32 %v4971_v38, %v4754_v14  ;;  %v5041_v43 = vpop.f32.mrb[50].mxu1  ;;  %v7093_v44 = vpop.f32.mrb[51].mxu0 }
 0x6e8   : > { %v4722_v58 = vadd.f32 %v4721_v34, %v4720_v27  ;;  %v4734_v45 = vadd.f32 %v4733_v35, %v4732_v28  ;;  %v5051_v46 = vadd.f32 %v5050_v36, %v5049_v33  ;;  %v5048_v47 = vmul.f32 %v5041_v43, %v4754_v14  ;;  %v7098_v48 = vpop.f32.mrb[51].mxu1 }
 0x6e9   : > { %v4729_v49 = vadd.f32 %v4728_v39, %v4727_v31  ;;  %v4741_v50 = vadd.f32 %v4740_v53, %v4739_v32  ;;  %v5058_v51 = vadd.f32 %v5057_v40, %v5056_v37  ;;  %v5063_v52 = vsel %vm4419_vm8, %v5047_v41, 0.0  ;;  %v8294_v32 = vld [vmem:[%s7620_s9 + $0xc] sm:$0xf]  ;;  %v4759_v37 = vld [vmem:[%s7745_s6] sm:$0x1] }
 0x6ea   : > { %v4735_v55 = vrot.slane %v4734_v45, 1  ;;  %v5052_v56 = vrot.slane %v5051_v46, 2  ;;  %v5064_v57 = vrot.slane %v5063_v52, 4  ;;  %v5070_v59 = vsel %vm4419_vm8, %v5048_v47, 0.0  ;;  %v5156_v60 = vpop.f32.mrb[52].mxu0 }
 0x6eb   : > { %v4748_v61 = vsel %vm1353_vm2, %v4729_v49, %v4722_v58  ;;  %v4742_v62 = vrot.slane %v4741_v50, 1  ;;  %v5059_v63 = vrot.slane %v5058_v51, 2  ;;  %v5071_v0 = vrot.slane %v5070_v59, 4  ;;  %v5226_v1 = vpop.f32.mrb[52].mxu1  ;;  %v7103_v2 = vpop.f32.mrb[53].mxu0  ;;  %7120 = vmatpush3.msk.msra.mxu0 %vm4419_vm8, %v5156_v60 }
 0x6ec   : > { %v4736_v3 = vadd.f32 %v4735_v55, %v4734_v45  ;;  %v5053_v4 = vadd.f32 %v5052_v56, %v5051_v46  ;;  %v5065_v5 = vadd.f32 %v5064_v57, %v5063_v52  ;;  %v7108_v6 = vpop.f32.mrb[53].mxu1  ;;  %7125 = vmatpush3.msk.msra.mxu1 %vm4419_vm8, %v5226_v1  ;;  %7122 = vmatmul.mubr.msk.f32.vlgmr.msra.gmra.mrb[56].mxu0 %vm4415_vm9, %v4756_v54  ;;  %v5984_v40 = vld [vmem:[%s7755_s27] sm:$0x1] }
 0x6ed   : > { %v4743_v7 = vadd.f32 %v4742_v62, %v4741_v50  ;;  %v5060_v8 = vadd.f32 %v5059_v63, %v5058_v51  ;;  %v5072_v9 = vadd.f32 %v5071_v0, %v5070_v59  ;;  %7127 = vmatmul.mubr.msk.f32.vlgmr.msra.gmra.mrb[56].mxu1 %vm4415_vm9, %v4756_v54  ;;  %7129 = vmatprep.subr.mxu0 %v7605_v15  ;;  %v4758_v45 = vld [vmem:[%s8459_s13] sm:$0x1] }
 0x6ee   : > { %v4749_v10 = vsel %vm1355_vm3, %v4736_v3, %v4748_v61  ;;  %v5054_v11 = vrot.slane %v5053_v4, 1  ;;  %v5066_v12 = vrot.slane %v5065_v5, 2  ;;  %v5296_v14 = vpop.f32.mrb[54].mxu0  ;;  %7134 = vmatprep.subr.mxu1 %v7605_v15  ;;  %7131 = vmatprep.mubr.msk.f32.mxu0 %vm7604_vm1, %v7605_v15  ;;  %v5983_v63 = vld [vmem:[%s7750_s20] sm:$0x1] }
 0x6ef   : > { %v4750_v16 = vsel %vm1357_vm4, %v4743_v7, %v4749_v10  ;;  %v5061_v17 = vrot.slane %v5060_v8, 1  ;;  %v5073_v18 = vrot.slane %v5072_v9, 2  ;;  %v5366_v19 = vpop.f32.mrb[54].mxu1  ;;  %v7113_v20 = vpop.f32.mrb[55].mxu0  ;;  %7130 = vmatpush3.msk.msra.mxu0 %vm4419_vm8, %v5296_v14  ;;  %7136 = vmatprep.mubr.msk.f32.mxu1 %vm7604_vm1, %v7605_v15 }
 0x6f0   : > { %v4752_v21 = vmul.f32 %v8186_v42, %v4750_v16  ;;  %v5055_v22 = vadd.f32 %v5054_v11, %v5053_v4  ;;  %v5067_v23 = vadd.f32 %v5066_v12, %v5065_v5  ;;  %v7118_v24 = vpop.f32.mrb[55].mxu1  ;;  %7135 = vmatpush3.msk.msra.mxu1 %vm4419_vm8, %v5366_v19  ;;  %7132 = vmatmul.mubr.msk.f32.vlgmr.msra.gmra.mrb[58].mxu0 %vm4415_vm9, %v4756_v54 }
 0x6f1   : > { %v5062_v25 = vadd.f32 %v5061_v17, %v5060_v8  ;;  %v5074_v26 = vadd.f32 %v5073_v18, %v5072_v9  ;;  %7137 = vmatmul.mubr.msk.f32.vlgmr.msra.gmra.mrb[58].mxu1 %vm4415_vm9, %v4756_v54  ;;  %7139 = vmatprep.subr.mxu0 %v7605_v15 }
 0x6f2   : > { %v5068_v27 = vrot.slane %v5067_v23, 1  ;;  %7144 = vmatprep.subr.mxu1 %v7605_v15  ;;  %7141 = vmatprep.mubr.msk.f32.mxu0 %vm7604_vm1, %v7605_v15  ;;  %v4753_v42 = vsub.f32 %v8191_v13, %v4752_v21  ;;  %v6642_v21 = vld [vmem:[%s7620_s9 + $0x10] sm:$0xf] }
 0x6f3   : > { %v5081_v28 = vsel %vm1353_vm2, %v5062_v25, %v5055_v22  ;;  %v5075_v29 = vrot.slane %v5074_v26, 1  ;;  %7146 = vmatprep.mubr.msk.f32.mxu1 %vm7604_vm1, %v7605_v15  ;;  %7140 = vmatpush3.msk.msra.mxu0 %vm5669_vm10, %v4759_v37 }
 0x6f4   : > { %v5069_v30 = vadd.f32 %v5068_v27, %v5067_v23  ;;  %7145 = vmatpush3.msk.msra.mxu1 %vm5669_vm10, %v4759_v37  ;;  %7149 = vmatprep.subr.mxu0 %v7605_v15  ;;  %v6291_v27 = vld [vmem:[#allocation5] sm:$0x1] }
 0x6f5   : > { %v5076_v31 = vadd.f32 %v5075_v29, %v5074_v26  ;;  %7154 = vmatprep.subr.mxu1 %v7605_v15 }
 0x6f6   : > { %v5082_v33 = vsel %vm1355_vm3, %v5069_v30, %v5081_v28 }
 0x6f7   : > { %v5083_v34 = vsel %vm1357_vm4, %v5076_v31, %v5082_v33 }
 0x6f8   : > { %v5085_v35 = vmul.f32 %v8294_v32, %v5083_v34 }
 0x6fa   : > { %v8299_v36 = vadd.f32 %v5085_v35, %v4753_v42 }
 0x7bf   : > { %v5442_v13 = vpop.f32.mrb[56].mxu0 }
 0x7c0   : > { %v5515_v38 = vpop.f32.mrb[56].mxu1  ;;  %v7123_v39 = vpop.f32.mrb[57].mxu0  ;;  %7142 = vmatmul.mubr.msk.f32.vlgmr.msra.gmra.mrb[60].mxu0 %vm5665_vm11, %v5442_v13 }
 0x7c1   : > { %v7128_v53 = vpop.f32.mrb[57].mxu1  ;;  %7147 = vmatmul.mubr.msk.f32.vlgmr.msra.gmra.mrb[60].mxu1 %vm5665_vm11, %v5515_v38  ;;  %7150 = vmatpush3.msk.msra.mxu0 %vm5669_vm10, %v4759_v37 }
 0x7c2   : > { %7151 = vmatprep.mubr.msk.f32.mxu0 %vm7604_vm1, %v7605_v15  ;;  %7155 = vmatpush3.msk.msra.mxu1 %vm5669_vm10, %v4759_v37 }
 0x7c3   : > { %v5588_v41 = vpop.f32.mrb[58].mxu0  ;;  %7156 = vmatprep.mubr.msk.f32.mxu1 %vm7604_vm1, %v7605_v15  ;;  %7159 = vmatprep.subr.mxu0 %v7605_v15 }
 0x7c4   : > { %v5661_v43 = vpop.f32.mrb[58].mxu1  ;;  %v7133_v44 = vpop.f32.mrb[59].mxu0  ;;  %7152 = vmatmul.mubr.msk.f32.vlgmr.msra.gmra.mrb[62].mxu0 %vm5665_vm11, %v5588_v41  ;;  %7164 = vmatprep.subr.mxu1 %v7605_v15 }
 0x7c5   : > { %v7138_v58 = vpop.f32.mrb[59].mxu1  ;;  %7157 = vmatmul.mubr.msk.f32.vlgmr.msra.gmra.mrb[62].mxu1 %vm5665_vm11, %v5661_v43  ;;  %7160 = vmatpush3.msk.msra.mxu0 %vm5669_vm10, %v5984_v40 }
 0x7c6   : > { %7161 = vmatprep.mubr.msk.f32.mxu0 %vm7604_vm1, %v7605_v15  ;;  %7165 = vmatpush3.msk.msra.mxu1 %vm5669_vm10, %v5984_v40 }
 0x7c7   : > { %7166 = vmatprep.mubr.msk.f32.mxu1 %vm7604_vm1, %v7605_v15  ;;  %7169 = vmatprep.subr.mxu0 %v7605_v15 }
 0x7c8   : > { %7162 = vmatmul.mubr.msk.f32.vlgmr.msra.gmra.mrb[64].mxu0 %vm5665_vm11, %v5442_v13  ;;  %7174 = vmatprep.subr.mxu1 %v7605_v15 }
 0x7c9   : > { %7167 = vmatmul.mubr.msk.f32.vlgmr.msra.gmra.mrb[64].mxu1 %vm5665_vm11, %v5515_v38  ;;  %7170 = vmatpush3.msk.msra.mxu0 %vm5669_vm10, %v5984_v40 }
 0x7ca   : > { %7171 = vmatprep.mubr.msk.f32.mxu0 %vm7604_vm1, %v7605_v15  ;;  %7175 = vmatpush3.msk.msra.mxu1 %vm5669_vm10, %v5984_v40 }
 0x7cb   : > { %7176 = vmatprep.mubr.msk.f32.mxu1 %vm7604_vm1, %v7605_v15  ;;  %7179 = vmatprep.subr.mxu0 %v7605_v15 }
 0x7cc   : > { %7172 = vmatmul.mubr.msk.f32.vlgmr.msra.gmra.mrb[66].mxu0 %vm5665_vm11, %v5588_v41 }
 0x7cd   : > { %7177 = vmatmul.mubr.msk.f32.vlgmr.msra.gmra.mrb[66].mxu1 %vm5665_vm11, %v5661_v43  ;;  %7181 = vmatprep.mubr.msk.f32.mxu0 %vm7604_vm1, %v7605_v15 }
 0x893   : > { %v5739_v46 = vpop.f32.mrb[60].mxu0 }
 0x894   : > { %v5812_v47 = vpop.f32.mrb[60].mxu1  ;;  %v7143_v48 = vpop.f32.mrb[61].mxu0  ;;  %v5962_v51 = vmul.f32 %v5739_v46, %v4758_v45 }
 0x895   : > { %v5963_v49 = vmul.f32 %v5812_v47, %v4758_v45  ;;  %v7148_v50 = vpop.f32.mrb[61].mxu1 }
 0x897   : > { %v5974_v52 = vrot.slane %v5963_v49, 7  ;;  %v5885_v54 = vpop.f32.mrb[62].mxu0 }
 0x898   : > { %v5964_v55 = vmul.f32 %v5885_v54, %v4758_v45  ;;  %v5958_v56 = vpop.f32.mrb[62].mxu1  ;;  %v7153_v57 = vpop.f32.mrb[63].mxu0 }
 0x899   : > { %v5975_v59 = vsel %vm1353_vm2, %v5974_v52, %v5962_v51  ;;  %v5965_v60 = vmul.f32 %v5958_v56, %v4758_v45  ;;  %v7158_v61 = vpop.f32.mrb[63].mxu1 }
 0x89a   : > { %v5976_v62 = vrot.slane %v5964_v55, 6 }
 0x89b   : > { %v5978_v15 = vrot.slane %v5965_v60, 5  ;;  %v6056_v0 = vpop.f32.mrb[64].mxu0 }
 0x89c   : > { %v5977_v1 = vsel %vm1355_vm3, %v5976_v62, %v5975_v59  ;;  %v6126_v2 = vpop.f32.mrb[64].mxu1  ;;  %v7163_v3 = vpop.f32.mrb[65].mxu0  ;;  %v6270_v8 = vmul.f32 %v6056_v0, %v5983_v63 }
 0x89d   : > { %v5979_v4 = vsel %vm1357_vm4, %v5978_v15, %v5977_v1  ;;  %v6271_v5 = vmul.f32 %v6126_v2, %v5983_v63  ;;  %v7168_v6 = vpop.f32.mrb[65].mxu1 }
 0x89e   : > { %v5981_v7 = vmul.f32 %v8294_v32, %v5979_v4 }
 0x89f   : > { %v6282_v9 = vrot.slane %v6271_v5, 7  ;;  %v6196_v10 = vpop.f32.mrb[66].mxu0 }
 0x8a0   : > { %v5982_v11 = vsub.f32 %v8299_v36, %v5981_v7  ;;  %v6272_v12 = vmul.f32 %v6196_v10, %v5983_v63  ;;  %v6266_v14 = vpop.f32.mrb[66].mxu1  ;;  %v7173_v16 = vpop.f32.mrb[67].mxu0 }
 0x8a1   : > { %v6283_v17 = vsel %vm1353_vm2, %v6282_v9, %v6270_v8  ;;  %v6273_v18 = vmul.f32 %v6266_v14, %v5983_v63  ;;  %v7178_v19 = vpop.f32.mrb[67].mxu1 }
 0x8a2   : > { %v6284_v20 = vrot.slane %v6272_v12, 6 }
 0x8a3   : > { %v6286_v22 = vrot.slane %v6273_v18, 5 }
 0x8a4   : > { %v6285_v23 = vsel %vm1355_vm3, %v6284_v20, %v6283_v17 }
 0x8a5   : > { %v6287_v24 = vsel %vm1357_vm4, %v6286_v22, %v6285_v23 }
 0x8a6   : > { %v6289_v25 = vmul.f32 %v6642_v21, %v6287_v24 }
 0x8a8   : > { %v6290_v26 = vadd.f32 %v6289_v25, %v5982_v11 }
 0x8aa   : > { %7180 = vmatpush3.msk.msra.mxu0 %vm3169_vm6, %v6290_v26 }
 0x8ab   : > { %7182 = vmatmul.mubr.msk.f32.vlgmr.msra.gmra.mrb[68].mxu0 %vm3165_vm7, %v6291_v27 }
 0x97e   : > { %v6364_v42 = vpop.f32.mrb[68].mxu0 }
 0x97f   : > { %6368 = vst [vmem:[%s969_s19] sm:$0x1] %v6364_v42  ;;  %v7183_v28 = vpop.f32.mrb[69].mxu0 }
 0x980   : > { %7504 = shalt.err (!%p7501_p10)
}
 0x981   : > { %s7505_s28 = scalar_lea.hbm %s8358_s7, 16  ;;  %s7509_s22 = scalar_lea.hbm %s8460_s14, 32 }
 0x982   : > { %p7506_p4 = scmp.ne.s32.totalorder %s8358_s7, %s7505_s28  ;;  %p7510_p8 = scmp.lt.u32.totalorder %s8358_s7, %s8460_s14 }
 0x983   : > { %p7511_p13 = scmp.lt.u32.totalorder %s7509_s22, %s7505_s28  ;;  %p7513_p0 = scmp.lt.u32.totalorder %s7505_s28, %s8358_s7 }
 0x984   : > { %p7507_p9 = pnand %p7506_p4, %p8461_p3 }
 0x985   : > { %p7512_p12 = por %p7511_p13, %p7510_p8 }
 0x986   : > { %p7508_p11 = pneg %p7507_p9 }
 0x987   : > { %p7514_p5 = por %p7513_p0, %p7512_p12 }
 0x989   : > { %p7515_p1 = pnand %p7514_p5, %p7508_p11 }
 0x98b   : > { %7518 = shalt.err (!%p7515_p1)
}
 0x98c   : > { %7246 = dma.vmem_to_hbm [thread:$0]  (%p8461_p3), %s8355_s18, 16, %s8358_s7, %s6370_s25  }
 0x98d PF: > { %s8462_s13 = sld [smem:[#allocation34_spill]]  ;;  %s8463_s19 = sld [smem:[#allocation35_spill]] }
 0x98e   : > { %p8465_p6 = scmp.ge.s32.totalorder %s7565_s15, 2 }
 0x993   : > { %s6394_s23 = sand.u32 1, %s8462_s13   ;;  %p8464_p2 = scmp.ne.s32.totalorder %s8463_s19, 0 }
 0x994   : > { %s6395_s1 = scalar_lea.sflag [#allocation4], %s6394_s23 }
 0x995   : > { %p7266_p7 = pnand %p8465_p6, %p8464_p2 }
 0x997   : > { %7548 = dma.done.wait (!%p7266_p7), %s6395_s1, 16  }
 0x998   : > { %7550 = vsyncadd (!%p7266_p7), %s6395_s1, 4294967280  ;;  %p74_p10 = scmp.ge.s32.totalorder %s7876_s4, 4   ;;  %s8466_s7 = smov %s7557_s10 }
 0x999   : > { %s8467_s10 = smov %s7561_s11  ;;  %s8468_s11 = smov %s7892_s2 }
 0x99a   : > { %s8469_s15 = smov %s7876_s4  ;;  %76 = sbr.rel (!%p74_p10) target bundleno = 64 (0x40), region = 230 }
 0x9a1   :  { %6399 = vsyncpa [#allocation3], 1 }
 0x9a2   :  { %6401 = vsyncpa [#allocation3 + $0x1], 1 }
 0x9a3   :  { %6402 = vsyncpa [#allocation6], 1 }
 0x9a4   :  { %6403 = vsyncpa [#allocation9], 1 }
 0x9a5   :  { %6404 = vsyncpa [#allocation4], 1 }
 0x9a6   :  { %6406 = vsyncpa [#allocation4 + $0x1], 1 }

</bundles_post_ra>
